<compile_context>
chip_gen: v7x
topology: tpu7x:2x2x1
jax: 0.10.0
libtpu: 0.0.40
codegen_flags: <defaults>
</compile_context>

<pallas_src>
import functools

import jax
import jax.numpy as jnp
from jax import lax
from jax.experimental import pallas as pl
from jax.experimental.pallas import tpu as pltpu


def _round_up(x: int, m: int) -> int:
    return ((x + m - 1) // m) * m


def _lstm_chunk_kernel(gx_ref, h0_ref, c0_ref, whh_hbm, out_ref,
                       whh_vmem, h_sc, c_sc, *,
                       tc: int, tail: int, hp: int, unroll: int):
    """One grid step == one chunk of LSTM time steps for one batch tile.

    gx_ref  : (tc, Bt, 4*hp) bf16  precomputed x@W_ih^T + (b_ih+b_hh), padded
    h0_ref  : (Bt, hp)       f32   initial hidden state (used at chunk 0 only)
    c0_ref  : (Bt, hp)       f32   initial cell state   (used at chunk 0 only)
    whh_hbm : (hp, 4*hp)     bf16  hidden->gates weights, raw HBM ref (pl.ANY)
    out_ref : (tc, Bt, hp)         hidden states for this chunk (lane-dense)
    whh_vmem: (hp, 4*hp)     bf16  single-buffered resident copy of W_hh^T
    h_sc/c_sc: (Bt, hp) f32 VMEM scratch carrying state across chunks
    """
    n = pl.program_id(1)

    @pl.when(n == 0)
    def _():
        # Weights become resident once per batch tile (single VMEM buffer, no
        # pipeline double-buffering).  Correct under megacore batch splitting
        # because the copy is keyed on the time axis, not on program_id(0)==0.
        pltpu.sync_copy(whh_hbm, whh_vmem)
        h_sc[...] = h0_ref[...]
        c_sc[...] = c0_ref[...]

    def step(t, carry):
        h, c = carry                                           # f32 (Bt, hp)
        # Recurrent projection: bf16 operands -> MXU, f32 accumulation.
        # TODO(synk): on v5e/v6e, holding W_hh in MXU weight regs for the whole
        # chunk (pltpu.matmul_push_rhs / matmul_acc_lhs / matmul_pop) would
        # shorten the serial h->gates->h chain; kept jnp.dot for portability.
        gates = gx_ref[t].astype(jnp.float32) + jnp.dot(
            h.astype(jnp.bfloat16), whh_vmem[...],
            preferred_element_type=jnp.float32)                # (Bt, 4*hp)
        # PyTorch gate order i, f, g, o.  hp is a multiple of 128, so each gate
        # slice is a whole-vreg (lane-aligned) view.
        i_g = jax.nn.sigmoid(gates[:, 0 * hp:1 * hp])
        f_g = jax.nn.sigmoid(gates[:, 1 * hp:2 * hp])
        g_g = jnp.tanh(gates[:, 2 * hp:3 * hp])
        o_g = jax.nn.sigmoid(gates[:, 3 * hp:4 * hp])
        c_new = f_g * c + i_g * g_g
        h_new = o_g * jnp.tanh(c_new)
        out_ref[t] = h_new.astype(out_ref.dtype)               # VMEM store
        return h_new, c_new

    def run(nsteps):
        h_f, c_f = lax.fori_loop(0, nsteps, step,
                                 (h_sc[...], c_sc[...]),
                                 unroll=min(unroll, nsteps))
        h_sc[...] = h_f
        c_sc[...] = c_f

    if tail == tc:
        run(tc)
    else:
        # Guard dead tail timesteps in the last chunk with a statically shorter
        # loop (no wasted matmul/transcendentals on zero-padded gx).
        is_last = n == pl.num_programs(1) - 1

        @pl.when(jnp.logical_not(is_last))
        def _():
            run(tc)

        @pl.when(is_last)
        def _():
            run(tail)


@functools.partial(jax.jit, static_argnames=("time_chunk", "batch_tile", "unroll"))
def my_lstm_forward(x, h0, c0, w_ih, w_hh, b_ih, b_hh, *,
                    time_chunk=32, batch_tile=256, unroll=8):
    """Pallas equivalent of MyLSTM.forward(inp, hc) -> output.

    x : (T, B, D) time-major input;  h0/c0 : (1, B, H);
    w_ih : (4H, D), w_hh : (4H, H), b_ih/b_hh : (4H,)  (PyTorch layouts).
    Returns (T, B, H).
    """
    T, B, D = x.shape
    H = h0.shape[-1]
    f32, bf16 = jnp.float32, jnp.bfloat16

    Hp = _round_up(H, 128)               # lane-align each gate block
    Bp = _round_up(B, 16)                # full packed bf16 sublanes on MXU feed
    Bt = min(batch_tile, Bp)             # per-kernel batch tile (vreg pressure)
    Bp = _round_up(Bp, Bt)
    n_b = Bp // Bt

    Tc = min(time_chunk, T)              # timesteps fused per grid step
    n_chunks = (T + Tc - 1) // Tc
    Tp = n_chunks * Tc
    tail = T - (n_chunks - 1) * Tc       # valid steps in the last chunk

    # ---- Pad/gate-block parameters BEFORE the hoisted matmul so gx is born padded.
    w_ih_p = jnp.pad(w_ih.T.reshape(D, 4, H),
                     ((0, 0), (0, 0), (0, Hp - H))).reshape(D, 4 * Hp).astype(bf16)
    bias_p = jnp.pad((b_ih + b_hh).reshape(4, H).astype(f32),
                     ((0, 0), (0, Hp - H))).reshape(4 * Hp)
    whh_p = jnp.pad(w_hh.T.reshape(H, 4, H),
                    ((0, Hp - H), (0, 0), (0, Hp - H))).reshape(Hp, 4 * Hp).astype(bf16)

    x_p = jnp.pad(x, ((0, 0), (0, Bp - B), (0, 0)))            # (T, Bp, D)
    h0_p = jnp.pad(h0.reshape(B, H).astype(f32), ((0, Bp - B), (0, Hp - H)))
    c0_p = jnp.pad(c0.reshape(B, H).astype(f32), ((0, Bp - B), (0, Hp - H)))

    # ---- Hoisted, non-recurrent input projection: one matmul, already padded,
    #      streamed to the kernel in bf16 to halve the dominant HBM read.
    gx = (jnp.dot(x_p.reshape(T * Bp, D).astype(bf16), w_ih_p,
                  preferred_element_type=f32) + bias_p[None, :]).astype(bf16)
    gx = gx.reshape(T, Bp, 4 * Hp)
    if Tp > T:
        gx = jnp.concatenate(
            [gx, jnp.zeros((Tp - T, Bp, 4 * Hp), bf16)], axis=0)

    out_dtype = x.dtype
    out_isz = jnp.dtype(out_dtype).itemsize

    # ---- Explicit VMEM budget (v7x has 64 MiB physical / 32 MiB scoped default).
    vmem_bytes = (2 * Tc * Bt * 4 * Hp * 2       # gx block, double-buffered, bf16
                  + 2 * Tc * Bt * Hp * out_isz   # out block, double-buffered
                  + Hp * 4 * Hp * 2              # W_hh, single VMEM buffer
                  + 2 * 2 * Bt * Hp * 4          # h0/c0 blocks
                  + 2 * Bt * Hp * 4)             # h/c carry scratch
    vmem_limit = int(min(max(2 * vmem_bytes, 16 * 2**20), 48 * 2**20))

    cost = pl.CostEstimate(
        flops=2 * T * Bp * Hp * 4 * Hp,
        transcendentals=5 * T * Bp * Hp,
        bytes_accessed=(Tp * Bp * 4 * Hp * 2 + Tp * Bp * Hp * out_isz
                        + Hp * 4 * Hp * 2 + 2 * Bp * Hp * 4),
    )

    out_p = pl.pallas_call(
        functools.partial(_lstm_chunk_kernel, tc=Tc, tail=tail, hp=Hp,
                          unroll=unroll),
        out_shape=jax.ShapeDtypeStruct((Tp, Bp, Hp), out_dtype),
        grid_spec=pltpu.PrefetchScalarGridSpec(
            num_scalar_prefetch=0,
            grid=(n_b, n_chunks),
            in_specs=[
                pl.BlockSpec((Tc, Bt, 4 * Hp), lambda b, n: (n, b, 0)),  # gx chunk
                pl.BlockSpec((Bt, Hp), lambda b, n: (b, 0)),             # h0
                pl.BlockSpec((Bt, Hp), lambda b, n: (b, 0)),             # c0
                pl.BlockSpec(memory_space=pl.ANY),                       # W_hh (HBM)
            ],
            out_specs=pl.BlockSpec((Tc, Bt, Hp), lambda b, n: (n, b, 0)),
            scratch_shapes=[
                pltpu.VMEM((Hp, 4 * Hp), bf16),  # resident W_hh (single buffer)
                pltpu.VMEM((Bt, Hp), f32),       # h carry across chunks
                pltpu.VMEM((Bt, Hp), f32),       # c carry across chunks
            ],
        ),
        compiler_params=pltpu.CompilerParams(
            # Batch tiles are independent (v7x: 2 TensorCores); time recurrence
            # is inherently serial.
            dimension_semantics=("parallel", "arbitrary"),
            vmem_limit_bytes=vmem_limit,
        ),
        cost_estimate=cost,
    )(gx, h0_p, c0_p, whh_p)

    return out_p[:T, :B, :H]


def _reference_lstm(x, h0, c0, w_ih, w_hh, b_ih, b_hh):
    """Pure-JAX f32 reference (matches torch.nn.LSTM single layer)."""
    T, B, D = x.shape
    H = h0.shape[-1]
    h = h0.reshape(B, H)
    c = c0.reshape(B, H)
    outs = []
    for t in range(T):
        gates = x[t] @ w_ih.T + h @ w_hh.T + b_ih + b_hh
        i_g = jax.nn.sigmoid(gates[:, 0 * H:1 * H])
        f_g = jax.nn.sigmoid(gates[:, 1 * H:2 * H])
        g_g = jnp.tanh(gates[:, 2 * H:3 * H])
        o_g = jax.nn.sigmoid(gates[:, 3 * H:4 * H])
        c = f_g * c + i_g * g_g
        h = o_g * jnp.tanh(c)
        outs.append(h)
    return jnp.stack(outs, axis=0)


if __name__ == "__main__":
    # Shapes consistent with the module:
    #   n_letters = len(ascii_lowercase + ' #') = 28 -> input_dim
    #   hidden_dim = 32, seq_len = 8, batch = 2
    seq_len, batch, input_dim, hidden_dim = 8, 2, 28, 32

    key = jax.random.PRNGKey(0)
    k_idx, k_h, k_c, k_wih, k_whh, k_bih, k_bhh = jax.random.split(key, 7)

    # One-hot character inputs, like ltt() in the original script.
    char_ids = jax.random.randint(k_idx, (seq_len, batch), 0, input_dim)
    x = jax.nn.one_hot(char_ids, input_dim, dtype=jnp.float32)  # (T, B, D)

    h0 = jax.random.normal(k_h, (1, batch, hidden_dim), jnp.float32) * 0.1
    c0 = jax.random.normal(k_c, (1, batch, hidden_dim), jnp.float32) * 0.1

    # Deterministic synthetic LSTM parameters (PyTorch shapes: (4H, D), (4H, H), (4H,)).
    scale = 1.0 / jnp.sqrt(hidden_dim)
    w_ih = jax.random.uniform(k_wih, (4 * hidden_dim, input_dim),
                              jnp.float32, -scale, scale)
    w_hh = jax.random.uniform(k_whh, (4 * hidden_dim, hidden_dim),
                              jnp.float32, -scale, scale)
    b_ih = jax.random.uniform(k_bih, (4 * hidden_dim,), jnp.float32, -scale, scale)
    b_hh = jax.random.uniform(k_bhh, (4 * hidden_dim,), jnp.float32, -scale, scale)

    out = my_lstm_forward(x, h0, c0, w_ih, w_hh, b_ih, b_hh)
    out = jax.block_until_ready(out)

    ref = _reference_lstm(x, h0, c0, w_ih, w_hh, b_ih, b_hh)
    assert out.shape == (seq_len, batch, hidden_dim)
    # Matmuls use bf16 operands (and gx is streamed bf16) with f32 accumulation,
    # so compare against the f32 reference with a correspondingly relaxed tolerance.
    assert jnp.allclose(out, ref, atol=2e-2, rtol=2e-2), float(
        jnp.max(jnp.abs(out - ref)))

    print("KERNEL_OK")
</pallas_src>

<mosaic_0001>
module attributes {stable_mosaic.version = 11 : i64} {
  func.func @_lstm_chunk_kernel(%arg0: i32, %arg1: i32, %arg2: memref<8x16x512xbf16, #tpu.memory_space<vmem>>, %arg3: memref<16x128xf32, #tpu.memory_space<vmem>>, %arg4: memref<16x128xf32, #tpu.memory_space<vmem>>, %arg5: memref<128x512xbf16, #tpu.memory_space<any>>, %arg6: memref<8x16x128xf32, #tpu.memory_space<vmem>>, %arg7: memref<128x512xbf16, #tpu.memory_space<vmem>>, %arg8: memref<16x128xf32, #tpu.memory_space<vmem>>, %arg9: memref<16x128xf32, #tpu.memory_space<vmem>>) attributes {dimension_semantics = [#tpu.dimension_semantics<parallel>, #tpu.dimension_semantics<arbitrary>], iteration_bounds = array<i64: 1, 1>, scalar_prefetch = 0 : i64, scratch_operands = 3 : i64, tpu.core_type = #tpu.core_type<tc>, window_params = [{transform_indices = @transform_0, window_bounds = array<i64: 8, 16, 512>}, {transform_indices = @transform_1, window_bounds = array<i64: 16, 128>}, {transform_indices = @transform_2, window_bounds = array<i64: 16, 128>}, {}, {transform_indices = @transform_4, window_bounds = array<i64: 8, 16, 128>}]} {
    %c0_i32 = arith.constant 0 : i32
    %0 = arith.cmpi eq, %arg1, %c0_i32 : i32
    %1 = arith.extui %0 : i1 to i32
    %c0_i32_0 = arith.constant 0 : i32
    %2 = arith.cmpi ne, %1, %c0_i32_0 : i32
    scf.if %2 {
      "tpu.region"() ({
        %307 = tpu.sem_alloc : memref<!tpu.dma_semaphore, #tpu.memory_space<semaphore_mem>>
        tpu.enqueue_dma source(%arg5 : memref<128x512xbf16, #tpu.memory_space<any>>) target(%arg7 : memref<128x512xbf16, #tpu.memory_space<vmem>>) target_semaphore(%307 : memref<!tpu.dma_semaphore, #tpu.memory_space<semaphore_mem>>)
        tpu.wait_dma2 semaphore(%307 : memref<!tpu.dma_semaphore, #tpu.memory_space<semaphore_mem>>) src(%arg5 : memref<128x512xbf16, #tpu.memory_space<any>>) dst(%arg7 : memref<128x512xbf16, #tpu.memory_space<vmem>>)
        tpu.yield
      }) : () -> ()
      %c0_88 = arith.constant 0 : index
      %c0_89 = arith.constant 0 : index
      %303 = vector.load %arg3[%c0_88, %c0_89] : memref<16x128xf32, #tpu.memory_space<vmem>>, vector<16x128xf32>
      %c0_90 = arith.constant 0 : index
      %c0_91 = arith.constant 0 : index
      %304 = vector.load %arg8[%c0_90, %c0_91] : memref<16x128xf32, #tpu.memory_space<vmem>>, vector<16x128xf32>
      tpu.vector_store %arg8[%c0_90, %c0_91], %303 {strides = array<i32>} : memref<16x128xf32, #tpu.memory_space<vmem>>, vector<16x128xf32>,
      %c0_92 = arith.constant 0 : index
      %c0_93 = arith.constant 0 : index
      %305 = vector.load %arg4[%c0_92, %c0_93] : memref<16x128xf32, #tpu.memory_space<vmem>>, vector<16x128xf32>
      %c0_94 = arith.constant 0 : index
      %c0_95 = arith.constant 0 : index
      %306 = vector.load %arg9[%c0_94, %c0_95] : memref<16x128xf32, #tpu.memory_space<vmem>>, vector<16x128xf32>
      tpu.vector_store %arg9[%c0_94, %c0_95], %305 {strides = array<i32>} : memref<16x128xf32, #tpu.memory_space<vmem>>, vector<16x128xf32>,
    } else {
    }
    %c0 = arith.constant 0 : index
    %c0_1 = arith.constant 0 : index
    %3 = vector.load %arg8[%c0, %c0_1] : memref<16x128xf32, #tpu.memory_space<vmem>>, vector<16x128xf32>
    %c0_2 = arith.constant 0 : index
    %c0_3 = arith.constant 0 : index
    %4 = vector.load %arg9[%c0_2, %c0_3] : memref<16x128xf32, #tpu.memory_space<vmem>>, vector<16x128xf32>
    %c0_i32_4 = arith.constant 0 : i32
    %5 = arith.index_cast %c0_i32_4 : i32 to index
    %c0_5 = arith.constant 0 : index
    %c0_6 = arith.constant 0 : index
    %6 = vector.load %arg2[%5, %c0_5, %c0_6] : memref<8x16x512xbf16, #tpu.memory_space<vmem>>, vector<1x16x512xbf16>
    %7 = vector.shape_cast %6 : vector<1x16x512xbf16> to vector<16x512xbf16>
    %8 = arith.extf %7 : vector<16x512xbf16> to vector<16x512xf32>
    %9 = arith.truncf %3 : vector<16x128xf32> to vector<16x128xbf16>
    %c0_7 = arith.constant 0 : index
    %c0_8 = arith.constant 0 : index
    %10 = vector.load %arg7[%c0_7, %c0_8] : memref<128x512xbf16, #tpu.memory_space<vmem>>, vector<128x512xbf16>
    %cst = arith.constant dense<0.000000e+00> : vector<16x512xf32>
    %11 = tpu.matmul %9, %10, %cst {dimension_numbers = #tpu.dot_dimension_numbers<[1], [0], [0], [1], [0, 0, 1, 1], [], []>} : vector<16x128xbf16>, vector<128x512xbf16>, vector<16x512xf32> -> vector<16x512xf32>
    %12 = arith.addf %8, %11 : vector<16x512xf32>
    %13 = vector.extract_strided_slice %12 {offsets = [0, 0], sizes = [16, 128], strides = [1, 1]} : vector<16x512xf32> to vector<16x128xf32>
    %14 = arith.negf %13 : vector<16x128xf32>
    %15 = math.exp %14 : vector<16x128xf32>
    %cst_9 = arith.constant 1.000000e+00 : f32
    %16 = vector.broadcast %cst_9 : f32 to vector<16x128xf32>
    %17 = arith.addf %16, %15 : vector<16x128xf32>
    %18 = arith.divf %16, %17 : vector<16x128xf32>
    %19 = vector.extract_strided_slice %12 {offsets = [0, 128], sizes = [16, 128], strides = [1, 1]} : vector<16x512xf32> to vector<16x128xf32>
    %20 = arith.negf %19 : vector<16x128xf32>
    %21 = math.exp %20 : vector<16x128xf32>
    %cst_10 = arith.constant 1.000000e+00 : f32
    %22 = vector.broadcast %cst_10 : f32 to vector<16x128xf32>
    %23 = arith.addf %22, %21 : vector<16x128xf32>
    %24 = arith.divf %22, %23 : vector<16x128xf32>
    %25 = vector.extract_strided_slice %12 {offsets = [0, 256], sizes = [16, 128], strides = [1, 1]} : vector<16x512xf32> to vector<16x128xf32>
    %26 = math.tanh %25 : vector<16x128xf32>
    %27 = vector.extract_strided_slice %12 {offsets = [0, 384], sizes = [16, 128], strides = [1, 1]} : vector<16x512xf32> to vector<16x128xf32>
    %28 = arith.negf %27 : vector<16x128xf32>
    %29 = math.exp %28 : vector<16x128xf32>
    %cst_11 = arith.constant 1.000000e+00 : f32
    %30 = vector.broadcast %cst_11 : f32 to vector<16x128xf32>
    %31 = arith.addf %30, %29 : vector<16x128xf32>
    %32 = arith.divf %30, %31 : vector<16x128xf32>
    %33 = arith.mulf %24, %4 : vector<16x128xf32>
    %34 = arith.mulf %18, %26 : vector<16x128xf32>
    %35 = arith.addf %33, %34 : vector<16x128xf32>
    %36 = math.tanh %35 : vector<16x128xf32>
    %37 = arith.mulf %32, %36 : vector<16x128xf32>
    %38 = arith.index_cast %c0_i32_4 : i32 to index
    %c0_12 = arith.constant 0 : index
    %c0_13 = arith.constant 0 : index
    %39 = vector.load %arg6[%38, %c0_12, %c0_13] : memref<8x16x128xf32, #tpu.memory_space<vmem>>, vector<1x16x128xf32>
    %40 = vector.shape_cast %39 : vector<1x16x128xf32> to vector<16x128xf32>
    %41 = vector.shape_cast %37 : vector<16x128xf32> to vector<1x16x128xf32>
    tpu.vector_store %arg6[%38, %c0_12, %c0_13], %41 {strides = array<i32>} : memref<8x16x128xf32, #tpu.memory_space<vmem>>, vector<1x16x128xf32>,
    %c1_i32 = arith.constant 1 : i32
    %42 = arith.index_cast %c1_i32 : i32 to index
    %c0_14 = arith.constant 0 : index
    %c0_15 = arith.constant 0 : index
    %43 = vector.load %arg2[%42, %c0_14, %c0_15] : memref<8x16x512xbf16, #tpu.memory_space<vmem>>, vector<1x16x512xbf16>
    %44 = vector.shape_cast %43 : vector<1x16x512xbf16> to vector<16x512xbf16>
    %45 = arith.extf %44 : vector<16x512xbf16> to vector<16x512xf32>
    %46 = arith.truncf %37 : vector<16x128xf32> to vector<16x128xbf16>
    %c0_16 = arith.constant 0 : index
    %c0_17 = arith.constant 0 : index
    %47 = vector.load %arg7[%c0_16, %c0_17] : memref<128x512xbf16, #tpu.memory_space<vmem>>, vector<128x512xbf16>
    %cst_18 = arith.constant dense<0.000000e+00> : vector<16x512xf32>
    %48 = tpu.matmul %46, %47, %cst_18 {dimension_numbers = #tpu.dot_dimension_numbers<[1], [0], [0], [1], [0, 0, 1, 1], [], []>} : vector<16x128xbf16>, vector<128x512xbf16>, vector<16x512xf32> -> vector<16x512xf32>
    %49 = arith.addf %45, %48 : vector<16x512xf32>
    %50 = vector.extract_strided_slice %49 {offsets = [0, 0], sizes = [16, 128], strides = [1, 1]} : vector<16x512xf32> to vector<16x128xf32>
    %51 = arith.negf %50 : vector<16x128xf32>
    %52 = math.exp %51 : vector<16x128xf32>
    %cst_19 = arith.constant 1.000000e+00 : f32
    %53 = vector.broadcast %cst_19 : f32 to vector<16x128xf32>
    %54 = arith.addf %53, %52 : vector<16x128xf32>
    %55 = arith.divf %53, %54 : vector<16x128xf32>
    %56 = vector.extract_strided_slice %49 {offsets = [0, 128], sizes = [16, 128], strides = [1, 1]} : vector<16x512xf32> to vector<16x128xf32>
    %57 = arith.negf %56 : vector<16x128xf32>
    %58 = math.exp %57 : vector<16x128xf32>
    %cst_20 = arith.constant 1.000000e+00 : f32
    %59 = vector.broadcast %cst_20 : f32 to vector<16x128xf32>
    %60 = arith.addf %59, %58 : vector<16x128xf32>
    %61 = arith.divf %59, %60 : vector<16x128xf32>
    %62 = vector.extract_strided_slice %49 {offsets = [0, 256], sizes = [16, 128], strides = [1, 1]} : vector<16x512xf32> to vector<16x128xf32>
    %63 = math.tanh %62 : vector<16x128xf32>
    %64 = vector.extract_strided_slice %49 {offsets = [0, 384], sizes = [16, 128], strides = [1, 1]} : vector<16x512xf32> to vector<16x128xf32>
    %65 = arith.negf %64 : vector<16x128xf32>
    %66 = math.exp %65 : vector<16x128xf32>
    %cst_21 = arith.constant 1.000000e+00 : f32
    %67 = vector.broadcast %cst_21 : f32 to vector<16x128xf32>
    %68 = arith.addf %67, %66 : vector<16x128xf32>
    %69 = arith.divf %67, %68 : vector<16x128xf32>
    %70 = arith.mulf %61, %35 : vector<16x128xf32>
    %71 = arith.mulf %55, %63 : vector<16x128xf32>
    %72 = arith.addf %70, %71 : vector<16x128xf32>
    %73 = math.tanh %72 : vector<16x128xf32>
    %74 = arith.mulf %69, %73 : vector<16x128xf32>
    %75 = arith.index_cast %c1_i32 : i32 to index
    %c0_22 = arith.constant 0 : index
    %c0_23 = arith.constant 0 : index
    %76 = vector.load %arg6[%75, %c0_22, %c0_23] : memref<8x16x128xf32, #tpu.memory_space<vmem>>, vector<1x16x128xf32>
    %77 = vector.shape_cast %76 : vector<1x16x128xf32> to vector<16x128xf32>
    %78 = vector.shape_cast %74 : vector<16x128xf32> to vector<1x16x128xf32>
    tpu.vector_store %arg6[%75, %c0_22, %c0_23], %78 {strides = array<i32>} : memref<8x16x128xf32, #tpu.memory_space<vmem>>, vector<1x16x128xf32>,
    %c2_i32 = arith.constant 2 : i32
    %79 = arith.index_cast %c2_i32 : i32 to index
    %c0_24 = arith.constant 0 : index
    %c0_25 = arith.constant 0 : index
    %80 = vector.load %arg2[%79, %c0_24, %c0_25] : memref<8x16x512xbf16, #tpu.memory_space<vmem>>, vector<1x16x512xbf16>
    %81 = vector.shape_cast %80 : vector<1x16x512xbf16> to vector<16x512xbf16>
    %82 = arith.extf %81 : vector<16x512xbf16> to vector<16x512xf32>
    %83 = arith.truncf %74 : vector<16x128xf32> to vector<16x128xbf16>
    %c0_26 = arith.constant 0 : index
    %c0_27 = arith.constant 0 : index
    %84 = vector.load %arg7[%c0_26, %c0_27] : memref<128x512xbf16, #tpu.memory_space<vmem>>, vector<128x512xbf16>
    %cst_28 = arith.constant dense<0.000000e+00> : vector<16x512xf32>
    %85 = tpu.matmul %83, %84, %cst_28 {dimension_numbers = #tpu.dot_dimension_numbers<[1], [0], [0], [1], [0, 0, 1, 1], [], []>} : vector<16x128xbf16>, vector<128x512xbf16>, vector<16x512xf32> -> vector<16x512xf32>
    %86 = arith.addf %82, %85 : vector<16x512xf32>
    %87 = vector.extract_strided_slice %86 {offsets = [0, 0], sizes = [16, 128], strides = [1, 1]} : vector<16x512xf32> to vector<16x128xf32>
    %88 = arith.negf %87 : vector<16x128xf32>
    %89 = math.exp %88 : vector<16x128xf32>
    %cst_29 = arith.constant 1.000000e+00 : f32
    %90 = vector.broadcast %cst_29 : f32 to vector<16x128xf32>
    %91 = arith.addf %90, %89 : vector<16x128xf32>
    %92 = arith.divf %90, %91 : vector<16x128xf32>
    %93 = vector.extract_strided_slice %86 {offsets = [0, 128], sizes = [16, 128], strides = [1, 1]} : vector<16x512xf32> to vector<16x128xf32>
    %94 = arith.negf %93 : vector<16x128xf32>
    %95 = math.exp %94 : vector<16x128xf32>
    %cst_30 = arith.constant 1.000000e+00 : f32
    %96 = vector.broadcast %cst_30 : f32 to vector<16x128xf32>
    %97 = arith.addf %96, %95 : vector<16x128xf32>
    %98 = arith.divf %96, %97 : vector<16x128xf32>
    %99 = vector.extract_strided_slice %86 {offsets = [0, 256], sizes = [16, 128], strides = [1, 1]} : vector<16x512xf32> to vector<16x128xf32>
    %100 = math.tanh %99 : vector<16x128xf32>
    %101 = vector.extract_strided_slice %86 {offsets = [0, 384], sizes = [16, 128], strides = [1, 1]} : vector<16x512xf32> to vector<16x128xf32>
    %102 = arith.negf %101 : vector<16x128xf32>
    %103 = math.exp %102 : vector<16x128xf32>
    %cst_31 = arith.constant 1.000000e+00 : f32
    %104 = vector.broadcast %cst_31 : f32 to vector<16x128xf32>
    %105 = arith.addf %104, %103 : vector<16x128xf32>
    %106 = arith.divf %104, %105 : vector<16x128xf32>
    %107 = arith.mulf %98, %72 : vector<16x128xf32>
    %108 = arith.mulf %92, %100 : vector<16x128xf32>
    %109 = arith.addf %107, %108 : vector<16x128xf32>
    %110 = math.tanh %109 : vector<16x128xf32>
    %111 = arith.mulf %106, %110 : vector<16x128xf32>
    %112 = arith.index_cast %c2_i32 : i32 to index
    %c0_32 = arith.constant 0 : index
    %c0_33 = arith.constant 0 : index
    %113 = vector.load %arg6[%112, %c0_32, %c0_33] : memref<8x16x128xf32, #tpu.memory_space<vmem>>, vector<1x16x128xf32>
    %114 = vector.shape_cast %113 : vector<1x16x128xf32> to vector<16x128xf32>
    %115 = vector.shape_cast %111 : vector<16x128xf32> to vector<1x16x128xf32>
    tpu.vector_store %arg6[%112, %c0_32, %c0_33], %115 {strides = array<i32>} : memref<8x16x128xf32, #tpu.memory_space<vmem>>, vector<1x16x128xf32>,
    %c3_i32 = arith.constant 3 : i32
    %116 = arith.index_cast %c3_i32 : i32 to index
    %c0_34 = arith.constant 0 : index
    %c0_35 = arith.constant 0 : index
    %117 = vector.load %arg2[%116, %c0_34, %c0_35] : memref<8x16x512xbf16, #tpu.memory_space<vmem>>, vector<1x16x512xbf16>
    %118 = vector.shape_cast %117 : vector<1x16x512xbf16> to vector<16x512xbf16>
    %119 = arith.extf %118 : vector<16x512xbf16> to vector<16x512xf32>
    %120 = arith.truncf %111 : vector<16x128xf32> to vector<16x128xbf16>
    %c0_36 = arith.constant 0 : index
    %c0_37 = arith.constant 0 : index
    %121 = vector.load %arg7[%c0_36, %c0_37] : memref<128x512xbf16, #tpu.memory_space<vmem>>, vector<128x512xbf16>
    %cst_38 = arith.constant dense<0.000000e+00> : vector<16x512xf32>
    %122 = tpu.matmul %120, %121, %cst_38 {dimension_numbers = #tpu.dot_dimension_numbers<[1], [0], [0], [1], [0, 0, 1, 1], [], []>} : vector<16x128xbf16>, vector<128x512xbf16>, vector<16x512xf32> -> vector<16x512xf32>
    %123 = arith.addf %119, %122 : vector<16x512xf32>
    %124 = vector.extract_strided_slice %123 {offsets = [0, 0], sizes = [16, 128], strides = [1, 1]} : vector<16x512xf32> to vector<16x128xf32>
    %125 = arith.negf %124 : vector<16x128xf32>
    %126 = math.exp %125 : vector<16x128xf32>
    %cst_39 = arith.constant 1.000000e+00 : f32
    %127 = vector.broadcast %cst_39 : f32 to vector<16x128xf32>
    %128 = arith.addf %127, %126 : vector<16x128xf32>
    %129 = arith.divf %127, %128 : vector<16x128xf32>
    %130 = vector.extract_strided_slice %123 {offsets = [0, 128], sizes = [16, 128], strides = [1, 1]} : vector<16x512xf32> to vector<16x128xf32>
    %131 = arith.negf %130 : vector<16x128xf32>
    %132 = math.exp %131 : vector<16x128xf32>
    %cst_40 = arith.constant 1.000000e+00 : f32
    %133 = vector.broadcast %cst_40 : f32 to vector<16x128xf32>
    %134 = arith.addf %133, %132 : vector<16x128xf32>
    %135 = arith.divf %133, %134 : vector<16x128xf32>
    %136 = vector.extract_strided_slice %123 {offsets = [0, 256], sizes = [16, 128], strides = [1, 1]} : vector<16x512xf32> to vector<16x128xf32>
    %137 = math.tanh %136 : vector<16x128xf32>
    %138 = vector.extract_strided_slice %123 {offsets = [0, 384], sizes = [16, 128], strides = [1, 1]} : vector<16x512xf32> to vector<16x128xf32>
    %139 = arith.negf %138 : vector<16x128xf32>
    %140 = math.exp %139 : vector<16x128xf32>
    %cst_41 = arith.constant 1.000000e+00 : f32
    %141 = vector.broadcast %cst_41 : f32 to vector<16x128xf32>
    %142 = arith.addf %141, %140 : vector<16x128xf32>
    %143 = arith.divf %141, %142 : vector<16x128xf32>
    %144 = arith.mulf %135, %109 : vector<16x128xf32>
    %145 = arith.mulf %129, %137 : vector<16x128xf32>
    %146 = arith.addf %144, %145 : vector<16x128xf32>
    %147 = math.tanh %146 : vector<16x128xf32>
    %148 = arith.mulf %143, %147 : vector<16x128xf32>
    %149 = arith.index_cast %c3_i32 : i32 to index
    %c0_42 = arith.constant 0 : index
    %c0_43 = arith.constant 0 : index
    %150 = vector.load %arg6[%149, %c0_42, %c0_43] : memref<8x16x128xf32, #tpu.memory_space<vmem>>, vector<1x16x128xf32>
    %151 = vector.shape_cast %150 : vector<1x16x128xf32> to vector<16x128xf32>
    %152 = vector.shape_cast %148 : vector<16x128xf32> to vector<1x16x128xf32>
    tpu.vector_store %arg6[%149, %c0_42, %c0_43], %152 {strides = array<i32>} : memref<8x16x128xf32, #tpu.memory_space<vmem>>, vector<1x16x128xf32>,
    %c4_i32 = arith.constant 4 : i32
    %153 = arith.index_cast %c4_i32 : i32 to index
    %c0_44 = arith.constant 0 : index
    %c0_45 = arith.constant 0 : index
    %154 = vector.load %arg2[%153, %c0_44, %c0_45] : memref<8x16x512xbf16, #tpu.memory_space<vmem>>, vector<1x16x512xbf16>
    %155 = vector.shape_cast %154 : vector<1x16x512xbf16> to vector<16x512xbf16>
    %156 = arith.extf %155 : vector<16x512xbf16> to vector<16x512xf32>
    %157 = arith.truncf %148 : vector<16x128xf32> to vector<16x128xbf16>
    %c0_46 = arith.constant 0 : index
    %c0_47 = arith.constant 0 : index
    %158 = vector.load %arg7[%c0_46, %c0_47] : memref<128x512xbf16, #tpu.memory_space<vmem>>, vector<128x512xbf16>
    %cst_48 = arith.constant dense<0.000000e+00> : vector<16x512xf32>
    %159 = tpu.matmul %157, %158, %cst_48 {dimension_numbers = #tpu.dot_dimension_numbers<[1], [0], [0], [1], [0, 0, 1, 1], [], []>} : vector<16x128xbf16>, vector<128x512xbf16>, vector<16x512xf32> -> vector<16x512xf32>
    %160 = arith.addf %156, %159 : vector<16x512xf32>
    %161 = vector.extract_strided_slice %160 {offsets = [0, 0], sizes = [16, 128], strides = [1, 1]} : vector<16x512xf32> to vector<16x128xf32>
    %162 = arith.negf %161 : vector<16x128xf32>
    %163 = math.exp %162 : vector<16x128xf32>
    %cst_49 = arith.constant 1.000000e+00 : f32
    %164 = vector.broadcast %cst_49 : f32 to vector<16x128xf32>
    %165 = arith.addf %164, %163 : vector<16x128xf32>
    %166 = arith.divf %164, %165 : vector<16x128xf32>
    %167 = vector.extract_strided_slice %160 {offsets = [0, 128], sizes = [16, 128], strides = [1, 1]} : vector<16x512xf32> to vector<16x128xf32>
    %168 = arith.negf %167 : vector<16x128xf32>
    %169 = math.exp %168 : vector<16x128xf32>
    %cst_50 = arith.constant 1.000000e+00 : f32
    %170 = vector.broadcast %cst_50 : f32 to vector<16x128xf32>
    %171 = arith.addf %170, %169 : vector<16x128xf32>
    %172 = arith.divf %170, %171 : vector<16x128xf32>
    %173 = vector.extract_strided_slice %160 {offsets = [0, 256], sizes = [16, 128], strides = [1, 1]} : vector<16x512xf32> to vector<16x128xf32>
    %174 = math.tanh %173 : vector<16x128xf32>
    %175 = vector.extract_strided_slice %160 {offsets = [0, 384], sizes = [16, 128], strides = [1, 1]} : vector<16x512xf32> to vector<16x128xf32>
    %176 = arith.negf %175 : vector<16x128xf32>
    %177 = math.exp %176 : vector<16x128xf32>
    %cst_51 = arith.constant 1.000000e+00 : f32
    %178 = vector.broadcast %cst_51 : f32 to vector<16x128xf32>
    %179 = arith.addf %178, %177 : vector<16x128xf32>
    %180 = arith.divf %178, %179 : vector<16x128xf32>
    %181 = arith.mulf %172, %146 : vector<16x128xf32>
    %182 = arith.mulf %166, %174 : vector<16x128xf32>
    %183 = arith.addf %181, %182 : vector<16x128xf32>
    %184 = math.tanh %183 : vector<16x128xf32>
    %185 = arith.mulf %180, %184 : vector<16x128xf32>
    %186 = arith.index_cast %c4_i32 : i32 to index
    %c0_52 = arith.constant 0 : index
    %c0_53 = arith.constant 0 : index
    %187 = vector.load %arg6[%186, %c0_52, %c0_53] : memref<8x16x128xf32, #tpu.memory_space<vmem>>, vector<1x16x128xf32>
    %188 = vector.shape_cast %187 : vector<1x16x128xf32> to vector<16x128xf32>
    %189 = vector.shape_cast %185 : vector<16x128xf32> to vector<1x16x128xf32>
    tpu.vector_store %arg6[%186, %c0_52, %c0_53], %189 {strides = array<i32>} : memref<8x16x128xf32, #tpu.memory_space<vmem>>, vector<1x16x128xf32>,
    %c5_i32 = arith.constant 5 : i32
    %190 = arith.index_cast %c5_i32 : i32 to index
    %c0_54 = arith.constant 0 : index
    %c0_55 = arith.constant 0 : index
    %191 = vector.load %arg2[%190, %c0_54, %c0_55] : memref<8x16x512xbf16, #tpu.memory_space<vmem>>, vector<1x16x512xbf16>
    %192 = vector.shape_cast %191 : vector<1x16x512xbf16> to vector<16x512xbf16>
    %193 = arith.extf %192 : vector<16x512xbf16> to vector<16x512xf32>
    %194 = arith.truncf %185 : vector<16x128xf32> to vector<16x128xbf16>
    %c0_56 = arith.constant 0 : index
    %c0_57 = arith.constant 0 : index
    %195 = vector.load %arg7[%c0_56, %c0_57] : memref<128x512xbf16, #tpu.memory_space<vmem>>, vector<128x512xbf16>
    %cst_58 = arith.constant dense<0.000000e+00> : vector<16x512xf32>
    %196 = tpu.matmul %194, %195, %cst_58 {dimension_numbers = #tpu.dot_dimension_numbers<[1], [0], [0], [1], [0, 0, 1, 1], [], []>} : vector<16x128xbf16>, vector<128x512xbf16>, vector<16x512xf32> -> vector<16x512xf32>
    %197 = arith.addf %193, %196 : vector<16x512xf32>
    %198 = vector.extract_strided_slice %197 {offsets = [0, 0], sizes = [16, 128], strides = [1, 1]} : vector<16x512xf32> to vector<16x128xf32>
    %199 = arith.negf %198 : vector<16x128xf32>
    %200 = math.exp %199 : vector<16x128xf32>
    %cst_59 = arith.constant 1.000000e+00 : f32
    %201 = vector.broadcast %cst_59 : f32 to vector<16x128xf32>
    %202 = arith.addf %201, %200 : vector<16x128xf32>
    %203 = arith.divf %201, %202 : vector<16x128xf32>
    %204 = vector.extract_strided_slice %197 {offsets = [0, 128], sizes = [16, 128], strides = [1, 1]} : vector<16x512xf32> to vector<16x128xf32>
    %205 = arith.negf %204 : vector<16x128xf32>
    %206 = math.exp %205 : vector<16x128xf32>
    %cst_60 = arith.constant 1.000000e+00 : f32
    %207 = vector.broadcast %cst_60 : f32 to vector<16x128xf32>
    %208 = arith.addf %207, %206 : vector<16x128xf32>
    %209 = arith.divf %207, %208 : vector<16x128xf32>
    %210 = vector.extract_strided_slice %197 {offsets = [0, 256], sizes = [16, 128], strides = [1, 1]} : vector<16x512xf32> to vector<16x128xf32>
    %211 = math.tanh %210 : vector<16x128xf32>
    %212 = vector.extract_strided_slice %197 {offsets = [0, 384], sizes = [16, 128], strides = [1, 1]} : vector<16x512xf32> to vector<16x128xf32>
    %213 = arith.negf %212 : vector<16x128xf32>
    %214 = math.exp %213 : vector<16x128xf32>
    %cst_61 = arith.constant 1.000000e+00 : f32
    %215 = vector.broadcast %cst_61 : f32 to vector<16x128xf32>
    %216 = arith.addf %215, %214 : vector<16x128xf32>
    %217 = arith.divf %215, %216 : vector<16x128xf32>
    %218 = arith.mulf %209, %183 : vector<16x128xf32>
    %219 = arith.mulf %203, %211 : vector<16x128xf32>
    %220 = arith.addf %218, %219 : vector<16x128xf32>
    %221 = math.tanh %220 : vector<16x128xf32>
    %222 = arith.mulf %217, %221 : vector<16x128xf32>
    %223 = arith.index_cast %c5_i32 : i32 to index
    %c0_62 = arith.constant 0 : index
    %c0_63 = arith.constant 0 : index
    %224 = vector.load %arg6[%223, %c0_62, %c0_63] : memref<8x16x128xf32, #tpu.memory_space<vmem>>, vector<1x16x128xf32>
    %225 = vector.shape_cast %224 : vector<1x16x128xf32> to vector<16x128xf32>
    %226 = vector.shape_cast %222 : vector<16x128xf32> to vector<1x16x128xf32>
    tpu.vector_store %arg6[%223, %c0_62, %c0_63], %226 {strides = array<i32>} : memref<8x16x128xf32, #tpu.memory_space<vmem>>, vector<1x16x128xf32>,
    %c6_i32 = arith.constant 6 : i32
    %227 = arith.index_cast %c6_i32 : i32 to index
    %c0_64 = arith.constant 0 : index
    %c0_65 = arith.constant 0 : index
    %228 = vector.load %arg2[%227, %c0_64, %c0_65] : memref<8x16x512xbf16, #tpu.memory_space<vmem>>, vector<1x16x512xbf16>
    %229 = vector.shape_cast %228 : vector<1x16x512xbf16> to vector<16x512xbf16>
    %230 = arith.extf %229 : vector<16x512xbf16> to vector<16x512xf32>
    %231 = arith.truncf %222 : vector<16x128xf32> to vector<16x128xbf16>
    %c0_66 = arith.constant 0 : index
    %c0_67 = arith.constant 0 : index
    %232 = vector.load %arg7[%c0_66, %c0_67] : memref<128x512xbf16, #tpu.memory_space<vmem>>, vector<128x512xbf16>
    %cst_68 = arith.constant dense<0.000000e+00> : vector<16x512xf32>
    %233 = tpu.matmul %231, %232, %cst_68 {dimension_numbers = #tpu.dot_dimension_numbers<[1], [0], [0], [1], [0, 0, 1, 1], [], []>} : vector<16x128xbf16>, vector<128x512xbf16>, vector<16x512xf32> -> vector<16x512xf32>
    %234 = arith.addf %230, %233 : vector<16x512xf32>
    %235 = vector.extract_strided_slice %234 {offsets = [0, 0], sizes = [16, 128], strides = [1, 1]} : vector<16x512xf32> to vector<16x128xf32>
    %236 = arith.negf %235 : vector<16x128xf32>
    %237 = math.exp %236 : vector<16x128xf32>
    %cst_69 = arith.constant 1.000000e+00 : f32
    %238 = vector.broadcast %cst_69 : f32 to vector<16x128xf32>
    %239 = arith.addf %238, %237 : vector<16x128xf32>
    %240 = arith.divf %238, %239 : vector<16x128xf32>
    %241 = vector.extract_strided_slice %234 {offsets = [0, 128], sizes = [16, 128], strides = [1, 1]} : vector<16x512xf32> to vector<16x128xf32>
    %242 = arith.negf %241 : vector<16x128xf32>
    %243 = math.exp %242 : vector<16x128xf32>
    %cst_70 = arith.constant 1.000000e+00 : f32
    %244 = vector.broadcast %cst_70 : f32 to vector<16x128xf32>
    %245 = arith.addf %244, %243 : vector<16x128xf32>
    %246 = arith.divf %244, %245 : vector<16x128xf32>
    %247 = vector.extract_strided_slice %234 {offsets = [0, 256], sizes = [16, 128], strides = [1, 1]} : vector<16x512xf32> to vector<16x128xf32>
    %248 = math.tanh %247 : vector<16x128xf32>
    %249 = vector.extract_strided_slice %234 {offsets = [0, 384], sizes = [16, 128], strides = [1, 1]} : vector<16x512xf32> to vector<16x128xf32>
    %250 = arith.negf %249 : vector<16x128xf32>
    %251 = math.exp %250 : vector<16x128xf32>
    %cst_71 = arith.constant 1.000000e+00 : f32
    %252 = vector.broadcast %cst_71 : f32 to vector<16x128xf32>
    %253 = arith.addf %252, %251 : vector<16x128xf32>
    %254 = arith.divf %252, %253 : vector<16x128xf32>
    %255 = arith.mulf %246, %220 : vector<16x128xf32>
    %256 = arith.mulf %240, %248 : vector<16x128xf32>
    %257 = arith.addf %255, %256 : vector<16x128xf32>
    %258 = math.tanh %257 : vector<16x128xf32>
    %259 = arith.mulf %254, %258 : vector<16x128xf32>
    %260 = arith.index_cast %c6_i32 : i32 to index
    %c0_72 = arith.constant 0 : index
    %c0_73 = arith.constant 0 : index
    %261 = vector.load %arg6[%260, %c0_72, %c0_73] : memref<8x16x128xf32, #tpu.memory_space<vmem>>, vector<1x16x128xf32>
    %262 = vector.shape_cast %261 : vector<1x16x128xf32> to vector<16x128xf32>
    %263 = vector.shape_cast %259 : vector<16x128xf32> to vector<1x16x128xf32>
    tpu.vector_store %arg6[%260, %c0_72, %c0_73], %263 {strides = array<i32>} : memref<8x16x128xf32, #tpu.memory_space<vmem>>, vector<1x16x128xf32>,
    %c7_i32 = arith.constant 7 : i32
    %264 = arith.index_cast %c7_i32 : i32 to index
    %c0_74 = arith.constant 0 : index
    %c0_75 = arith.constant 0 : index
    %265 = vector.load %arg2[%264, %c0_74, %c0_75] : memref<8x16x512xbf16, #tpu.memory_space<vmem>>, vector<1x16x512xbf16>
    %266 = vector.shape_cast %265 : vector<1x16x512xbf16> to vector<16x512xbf16>
    %267 = arith.extf %266 : vector<16x512xbf16> to vector<16x512xf32>
    %268 = arith.truncf %259 : vector<16x128xf32> to vector<16x128xbf16>
    %c0_76 = arith.constant 0 : index
    %c0_77 = arith.constant 0 : index
    %269 = vector.load %arg7[%c0_76, %c0_77] : memref<128x512xbf16, #tpu.memory_space<vmem>>, vector<128x512xbf16>
    %cst_78 = arith.constant dense<0.000000e+00> : vector<16x512xf32>
    %270 = tpu.matmul %268, %269, %cst_78 {dimension_numbers = #tpu.dot_dimension_numbers<[1], [0], [0], [1], [0, 0, 1, 1], [], []>} : vector<16x128xbf16>, vector<128x512xbf16>, vector<16x512xf32> -> vector<16x512xf32>
    %271 = arith.addf %267, %270 : vector<16x512xf32>
    %272 = vector.extract_strided_slice %271 {offsets = [0, 0], sizes = [16, 128], strides = [1, 1]} : vector<16x512xf32> to vector<16x128xf32>
    %273 = arith.negf %272 : vector<16x128xf32>
    %274 = math.exp %273 : vector<16x128xf32>
    %cst_79 = arith.constant 1.000000e+00 : f32
    %275 = vector.broadcast %cst_79 : f32 to vector<16x128xf32>
    %276 = arith.addf %275, %274 : vector<16x128xf32>
    %277 = arith.divf %275, %276 : vector<16x128xf32>
    %278 = vector.extract_strided_slice %271 {offsets = [0, 128], sizes = [16, 128], strides = [1, 1]} : vector<16x512xf32> to vector<16x128xf32>
    %279 = arith.negf %278 : vector<16x128xf32>
    %280 = math.exp %279 : vector<16x128xf32>
    %cst_80 = arith.constant 1.000000e+00 : f32
    %281 = vector.broadcast %cst_80 : f32 to vector<16x128xf32>
    %282 = arith.addf %281, %280 : vector<16x128xf32>
    %283 = arith.divf %281, %282 : vector<16x128xf32>
    %284 = vector.extract_strided_slice %271 {offsets = [0, 256], sizes = [16, 128], strides = [1, 1]} : vector<16x512xf32> to vector<16x128xf32>
    %285 = math.tanh %284 : vector<16x128xf32>
    %286 = vector.extract_strided_slice %271 {offsets = [0, 384], sizes = [16, 128], strides = [1, 1]} : vector<16x512xf32> to vector<16x128xf32>
    %287 = arith.negf %286 : vector<16x128xf32>
    %288 = math.exp %287 : vector<16x128xf32>
    %cst_81 = arith.constant 1.000000e+00 : f32
    %289 = vector.broadcast %cst_81 : f32 to vector<16x128xf32>
    %290 = arith.addf %289, %288 : vector<16x128xf32>
    %291 = arith.divf %289, %290 : vector<16x128xf32>
    %292 = arith.mulf %283, %257 : vector<16x128xf32>
    %293 = arith.mulf %277, %285 : vector<16x128xf32>
    %294 = arith.addf %292, %293 : vector<16x128xf32>
    %295 = math.tanh %294 : vector<16x128xf32>
    %296 = arith.mulf %291, %295 : vector<16x128xf32>
    %297 = arith.index_cast %c7_i32 : i32 to index
    %c0_82 = arith.constant 0 : index
    %c0_83 = arith.constant 0 : index
    %298 = vector.load %arg6[%297, %c0_82, %c0_83] : memref<8x16x128xf32, #tpu.memory_space<vmem>>, vector<1x16x128xf32>
    %299 = vector.shape_cast %298 : vector<1x16x128xf32> to vector<16x128xf32>
    %300 = vector.shape_cast %296 : vector<16x128xf32> to vector<1x16x128xf32>
    tpu.vector_store %arg6[%297, %c0_82, %c0_83], %300 {strides = array<i32>} : memref<8x16x128xf32, #tpu.memory_space<vmem>>, vector<1x16x128xf32>,
    %c8_i32 = arith.constant 8 : i32
    %c0_84 = arith.constant 0 : index
    %c0_85 = arith.constant 0 : index
    %301 = vector.load %arg8[%c0_84, %c0_85] : memref<16x128xf32, #tpu.memory_space<vmem>>, vector<16x128xf32>
    tpu.vector_store %arg8[%c0_84, %c0_85], %296 {strides = array<i32>} : memref<16x128xf32, #tpu.memory_space<vmem>>, vector<16x128xf32>,
    %c0_86 = arith.constant 0 : index
    %c0_87 = arith.constant 0 : index
    %302 = vector.load %arg9[%c0_86, %c0_87] : memref<16x128xf32, #tpu.memory_space<vmem>>, vector<16x128xf32>
    tpu.vector_store %arg9[%c0_86, %c0_87], %294 {strides = array<i32>} : memref<16x128xf32, #tpu.memory_space<vmem>>, vector<16x128xf32>,
    return
  }
  func.func @transform_0(%arg0: i32, %arg1: i32) -> (i32, i32, i32) {
    %c0_i32 = arith.constant 0 : i32
    %c0_i32_0 = arith.constant 0 : i32
    return %arg1, %arg0, %c0_i32 : i32, i32, i32
  }
  func.func @transform_1(%arg0: i32, %arg1: i32) -> (i32, i32) {
    %c0_i32 = arith.constant 0 : i32
    %c0_i32_0 = arith.constant 0 : i32
    return %arg0, %c0_i32 : i32, i32
  }
  func.func @transform_2(%arg0: i32, %arg1: i32) -> (i32, i32) {
    %c0_i32 = arith.constant 0 : i32
    %c0_i32_0 = arith.constant 0 : i32
    return %arg0, %c0_i32 : i32, i32
  }
  func.func @transform_4(%arg0: i32, %arg1: i32) -> (i32, i32, i32) {
    %c0_i32 = arith.constant 0 : i32
    %c0_i32_0 = arith.constant 0 : i32
    return %arg1, %arg0, %c0_i32 : i32, i32, i32
  }
}

</mosaic_0001>

<bundles_post_ra>
// kernel: my_lstm_forward.1
= control target key start
LH: loop header
LB: loop body
LE: loop exit
PB: predicated region body
PF: predicated region fallthrough
CT: control target
= control target key end

     0   :  { %s3046_s0 = inlined_call_operand.vmem [shape: bf16[8,16,512], index: 0, kind: input, shape index: {}]   ;;  %s3047_s1 = inlined_call_operand.vmem [shape: f32[16,128], index: 1, kind: input, shape index: {}]   ;;  %s3048_s2 = inlined_call_operand.vmem [shape: f32[16,128], index: 2, kind: input, shape index: {}]   ;;  %s3049_s3 = inlined_call_operand.vmem [shape: bf16[128,512], index: 3, kind: input, shape index: {}]   ;;  %s3050_s4 = inlined_call_operand.vmem [shape: f32[8,16,128], index: 4, kind: output, shape index: {}]  }
   0x1   :  { %v37_v0 = vld [vmem:[%s3049_s3] sm:$0xf]  ;;  %v39_v1 = vld [vmem:[%s3049_s3 + $0x10] sm:$0xf]  ;;  %v41_v2 = vld [vmem:[%s3049_s3 + $0x4] sm:$0xf] }
   0x2   :  { %38 = vst [vmem:[#allocation2] sm:$0xf] %v37_v0  ;;  %40 = vst [vmem:[#allocation2 + $0x4] sm:$0xf] %v39_v1  ;;  %v43_v3 = vld [vmem:[%s3049_s3 + $0x14] sm:$0xf] }
   0x3   :  { %42 = vst [vmem:[#allocation2 + $0x8] sm:$0xf] %v41_v2  ;;  %v45_v4 = vld [vmem:[%s3049_s3 + $0x8] sm:$0xf]  ;;  %v47_v5 = vld [vmem:[%s3049_s3 + $0x18] sm:$0xf] }
   0x4   :  { %44 = vst [vmem:[#allocation2 + $0xc] sm:$0xf] %v43_v3  ;;  %46 = vst [vmem:[#allocation2 + $0x10] sm:$0xf] %v45_v4  ;;  %v49_v6 = vld [vmem:[%s3049_s3 + $0xc] sm:$0xf] }
   0x5   :  { %48 = vst [vmem:[#allocation2 + $0x14] sm:$0xf] %v47_v5  ;;  %v51_v7 = vld [vmem:[%s3049_s3 + $0x1c] sm:$0xff]   ;;  %v55_v8 = vld [vmem:[%s3049_s3 + $0x30] sm:$0xf] }
   0x6   :  { %50 = vst [vmem:[#allocation2 + $0x18] sm:$0xf] %v49_v6  ;;  %52 = vst [vmem:[#allocation2 + $0x1c] sm:$0xff] %v51_v7   ;;  %v57_v9 = vld [vmem:[%s3049_s3 + $0x24] sm:$0xf]  ;;  %v67_v14 = vld [vmem:[%s3049_s3 + $0x3c] sm:$0xff]  }
   0x7   :  { %56 = vst [vmem:[#allocation2 + $0x24] sm:$0xf] %v55_v8  ;;  %v59_v10 = vld [vmem:[%s3049_s3 + $0x34] sm:$0xf]  ;;  %v61_v11 = vld [vmem:[%s3049_s3 + $0x28] sm:$0xf] }
   0x8   :  { %58 = vst [vmem:[#allocation2 + $0x28] sm:$0xf] %v57_v9  ;;  %60 = vst [vmem:[#allocation2 + $0x2c] sm:$0xf] %v59_v10  ;;  %v63_v12 = vld [vmem:[%s3049_s3 + $0x38] sm:$0xf] }
   0x9   :  { %62 = vst [vmem:[#allocation2 + $0x30] sm:$0xf] %v61_v11  ;;  %v65_v13 = vld [vmem:[%s3049_s3 + $0x2c] sm:$0xf]  ;;  %64 = vst [vmem:[#allocation2 + $0x34] sm:$0xf] %v63_v12 }
   0xa   :  { %66 = vst [vmem:[#allocation2 + $0x38] sm:$0xf] %v65_v13  ;;  %68 = vst [vmem:[#allocation2 + $0x3c] sm:$0xff] %v67_v14   ;;  %v71_v15 = vld [vmem:[%s3049_s3 + $0x50] sm:$0xf]  ;;  %v83_v21 = vld [vmem:[%s3049_s3 + $0x5c] sm:$0xff]  }
   0xb   :  { %v73_v16 = vld [vmem:[%s3049_s3 + $0x44] sm:$0xf]  ;;  %v75_v17 = vld [vmem:[%s3049_s3 + $0x54] sm:$0xf]  ;;  %72 = vst [vmem:[#allocation2 + $0x44] sm:$0xf] %v71_v15 }
   0xc   :  { %74 = vst [vmem:[#allocation2 + $0x48] sm:$0xf] %v73_v16  ;;  %76 = vst [vmem:[#allocation2 + $0x4c] sm:$0xf] %v75_v17  ;;  %v77_v18 = vld [vmem:[%s3049_s3 + $0x48] sm:$0xf] }
   0xd   :  { %v79_v19 = vld [vmem:[%s3049_s3 + $0x58] sm:$0xf]  ;;  %v81_v20 = vld [vmem:[%s3049_s3 + $0x4c] sm:$0xf]  ;;  %78 = vst [vmem:[#allocation2 + $0x50] sm:$0xf] %v77_v18 }
   0xe   :  { %80 = vst [vmem:[#allocation2 + $0x54] sm:$0xf] %v79_v19  ;;  %82 = vst [vmem:[#allocation2 + $0x58] sm:$0xf] %v81_v20  ;;  %v87_v22 = vld [vmem:[%s3049_s3 + $0x70] sm:$0xf] }
   0xf   :  { %v89_v23 = vld [vmem:[%s3049_s3 + $0x64] sm:$0xf]  ;;  %84 = vst [vmem:[#allocation2 + $0x5c] sm:$0xff] %v83_v21   ;;  %88 = vst [vmem:[#allocation2 + $0x64] sm:$0xf] %v87_v22  ;;  %v99_v28 = vld [vmem:[%s3049_s3 + $0x7c] sm:$0xff]  }
  0x10   :  { %90 = vst [vmem:[#allocation2 + $0x68] sm:$0xf] %v89_v23  ;;  %v91_v24 = vld [vmem:[%s3049_s3 + $0x74] sm:$0xf]  ;;  %v93_v25 = vld [vmem:[%s3049_s3 + $0x68] sm:$0xf] }
  0x11   :  { %v95_v26 = vld [vmem:[%s3049_s3 + $0x78] sm:$0xf]  ;;  %92 = vst [vmem:[#allocation2 + $0x6c] sm:$0xf] %v91_v24  ;;  %94 = vst [vmem:[#allocation2 + $0x70] sm:$0xf] %v93_v25 }
  0x12   :  { %96 = vst [vmem:[#allocation2 + $0x74] sm:$0xf] %v95_v26  ;;  %v97_v27 = vld [vmem:[%s3049_s3 + $0x6c] sm:$0xf]  ;;  %v103_v29 = vld [vmem:[%s3049_s3 + $0x90] sm:$0xf] }
  0x13   :  { %98 = vst [vmem:[#allocation2 + $0x78] sm:$0xf] %v97_v27  ;;  %100 = vst [vmem:[#allocation2 + $0x7c] sm:$0xff] %v99_v28   ;;  %v105_v30 = vld [vmem:[%s3049_s3 + $0x84] sm:$0xf]  ;;  %v115_v35 = vld [vmem:[%s3049_s3 + $0x9c] sm:$0xff]  }
  0x14   :  { %104 = vst [vmem:[#allocation2 + $0x84] sm:$0xf] %v103_v29  ;;  %v107_v31 = vld [vmem:[%s3049_s3 + $0x94] sm:$0xf]  ;;  %v109_v32 = vld [vmem:[%s3049_s3 + $0x88] sm:$0xf] }
  0x15   :  { %106 = vst [vmem:[#allocation2 + $0x88] sm:$0xf] %v105_v30  ;;  %108 = vst [vmem:[#allocation2 + $0x8c] sm:$0xf] %v107_v31  ;;  %v111_v33 = vld [vmem:[%s3049_s3 + $0x98] sm:$0xf] }
  0x16   :  { %110 = vst [vmem:[#allocation2 + $0x90] sm:$0xf] %v109_v32  ;;  %v113_v34 = vld [vmem:[%s3049_s3 + $0x8c] sm:$0xf]  ;;  %112 = vst [vmem:[#allocation2 + $0x94] sm:$0xf] %v111_v33 }
  0x17   :  { %114 = vst [vmem:[#allocation2 + $0x98] sm:$0xf] %v113_v34  ;;  %116 = vst [vmem:[#allocation2 + $0x9c] sm:$0xff] %v115_v35   ;;  %v119_v36 = vld [vmem:[%s3049_s3 + $0xb0] sm:$0xf]  ;;  %v131_v42 = vld [vmem:[%s3049_s3 + $0xbc] sm:$0xff]  }
  0x18   :  { %v121_v37 = vld [vmem:[%s3049_s3 + $0xa4] sm:$0xf]  ;;  %v123_v38 = vld [vmem:[%s3049_s3 + $0xb4] sm:$0xf]  ;;  %120 = vst [vmem:[#allocation2 + $0xa4] sm:$0xf] %v119_v36 }
  0x19   :  { %122 = vst [vmem:[#allocation2 + $0xa8] sm:$0xf] %v121_v37  ;;  %124 = vst [vmem:[#allocation2 + $0xac] sm:$0xf] %v123_v38  ;;  %v125_v39 = vld [vmem:[%s3049_s3 + $0xa8] sm:$0xf] }
  0x1a   :  { %v127_v40 = vld [vmem:[%s3049_s3 + $0xb8] sm:$0xf]  ;;  %v129_v41 = vld [vmem:[%s3049_s3 + $0xac] sm:$0xf]  ;;  %126 = vst [vmem:[#allocation2 + $0xb0] sm:$0xf] %v125_v39 }
  0x1b   :  { %128 = vst [vmem:[#allocation2 + $0xb4] sm:$0xf] %v127_v40  ;;  %130 = vst [vmem:[#allocation2 + $0xb8] sm:$0xf] %v129_v41  ;;  %v135_v43 = vld [vmem:[%s3049_s3 + $0xd0] sm:$0xf] }
  0x1c   :  { %v137_v44 = vld [vmem:[%s3049_s3 + $0xc4] sm:$0xf]  ;;  %132 = vst [vmem:[#allocation2 + $0xbc] sm:$0xff] %v131_v42   ;;  %136 = vst [vmem:[#allocation2 + $0xc4] sm:$0xf] %v135_v43  ;;  %v147_v49 = vld [vmem:[%s3049_s3 + $0xdc] sm:$0xff]  }
  0x1d   :  { %138 = vst [vmem:[#allocation2 + $0xc8] sm:$0xf] %v137_v44  ;;  %v139_v45 = vld [vmem:[%s3049_s3 + $0xd4] sm:$0xf]  ;;  %v141_v46 = vld [vmem:[%s3049_s3 + $0xc8] sm:$0xf] }
  0x1e   :  { %v143_v47 = vld [vmem:[%s3049_s3 + $0xd8] sm:$0xf]  ;;  %140 = vst [vmem:[#allocation2 + $0xcc] sm:$0xf] %v139_v45  ;;  %142 = vst [vmem:[#allocation2 + $0xd0] sm:$0xf] %v141_v46 }
  0x1f   :  { %144 = vst [vmem:[#allocation2 + $0xd4] sm:$0xf] %v143_v47  ;;  %v145_v48 = vld [vmem:[%s3049_s3 + $0xcc] sm:$0xf]  ;;  %v151_v50 = vld [vmem:[%s3049_s3 + $0xf0] sm:$0xf] }
  0x20   :  { %146 = vst [vmem:[#allocation2 + $0xd8] sm:$0xf] %v145_v48  ;;  %148 = vst [vmem:[#allocation2 + $0xdc] sm:$0xff] %v147_v49   ;;  %v153_v51 = vld [vmem:[%s3049_s3 + $0xe4] sm:$0xf] }
  0x21   :  { %152 = vst [vmem:[#allocation2 + $0xe4] sm:$0xf] %v151_v50  ;;  %v155_v52 = vld [vmem:[%s3049_s3 + $0xf4] sm:$0xf]  ;;  %v157_v53 = vld [vmem:[%s3049_s3 + $0xe8] sm:$0xf] }
  0x22   :  { %154 = vst [vmem:[#allocation2 + $0xe8] sm:$0xf] %v153_v51  ;;  %156 = vst [vmem:[#allocation2 + $0xec] sm:$0xf] %v155_v52  ;;  %v159_v54 = vld [vmem:[%s3049_s3 + $0xf8] sm:$0xf] }
  0x23   :  { %158 = vst [vmem:[#allocation2 + $0xf0] sm:$0xf] %v157_v53  ;;  %v161_v55 = vld [vmem:[%s3049_s3 + $0xec] sm:$0xf]  ;;  %v163_v56 = vld [vmem:[%s3049_s3 + $0xfc] sm:$0xf] }
  0x24   :  { %160 = vst [vmem:[#allocation2 + $0xf4] sm:$0xf] %v159_v54  ;;  %162 = vst [vmem:[#allocation2 + $0xf8] sm:$0xf] %v161_v55 }
  0x25   :  { %164 = vst [vmem:[#allocation2 + $0xfc] sm:$0xf] %v163_v56 }
  0x26   :  { %323 = vsyncadd [#allocation5], 4096 }
  0x27   :  { %2235 = dma.done.wait [#allocation5], 4096 }
  0x28   :  { %2236 = vsyncadd [#allocation5], 4294963200  ;;  %v2434_v57 = vld [vmem:[#allocation2 + $0x8] sm:$0xff]  ;;  %v2436_v58 = vld [vmem:[#allocation2] sm:$0xff]  ;;  %v2237_v60 = vmov 0  }
  0x29   :  { %v2438_v59 = vld [vmem:[#allocation2 + $0x28] sm:$0xff]  ;;  %385 = vmatprep.subr.bf16.mxu0 %v2434_v57  ;;  %417 = vmatprep.mubr.bf16.mxu0 %v2237_v60  ;;  %v2443_v61 = vld [vmem:[#allocation2 + $0x18] sm:$0xff]  ;;  %v2447_v62 = vld [vmem:[#allocation2 + $0x20] sm:$0xff] }
  0x2a   :  { %386 = vmatpush1.bf16.msra.mxu0 %v2436_v58  ;;  %460 = vmatprep.mubr.bf16.mxu1 %v2237_v60  ;;  %v2450_v63 = vld [vmem:[#allocation2 + $0x10] sm:$0xff]  ;;  %v2452_v0 = vld [vmem:[#allocation2 + $0x38] sm:$0xff]  ;;  %v2454_v1 = vld [vmem:[#allocation2 + $0x48] sm:$0xff] }
  0x2b   :  { %387 = vmatprep.subr.bf16.mxu0 %v2438_v59  ;;  %428 = vmatprep.subr.bf16.mxu1 %v2443_v61  ;;  %v2458_v2 = vld [vmem:[#allocation2 + $0x30] sm:$0xff]  ;;  %v2461_v3 = vld [vmem:[#allocation2 + $0x58] sm:$0xff]  ;;  %v2464_v4 = vld [vmem:[#allocation2 + $0x40] sm:$0xff] }
  0x2c   :  { %429 = vmatpush1.bf16.msra.mxu1 %v2450_v63  ;;  %v2466_v5 = vld [vmem:[#allocation2 + $0x68] sm:$0xff]  ;;  %v2470_v6 = vld [vmem:[#allocation2 + $0x50] sm:$0xff]  ;;  %v2473_v7 = vld [vmem:[#allocation2 + $0x78] sm:$0xff] }
  0x2d   :  { %430 = vmatprep.subr.bf16.mxu1 %v2452_v0  ;;  %v2476_v8 = vld [vmem:[#allocation2 + $0x60] sm:$0xff]  ;;  %v2478_v9 = vld [vmem:[#allocation2 + $0x88] sm:$0xff]  ;;  %v2482_v10 = vld [vmem:[#allocation2 + $0x70] sm:$0xff] }
  0x2e   :  { %388 = vmatpush1.bf16.msra.mxu0 %v2447_v62  ;;  %v2485_v11 = vld [vmem:[#allocation2 + $0x98] sm:$0xff]  ;;  %v2488_v12 = vld [vmem:[#allocation2 + $0x80] sm:$0xff]  ;;  %v2490_v13 = vld [vmem:[#allocation2 + $0xa8] sm:$0xff] }
  0x2f   :  { %389 = vmatprep.subr.bf16.mxu0 %v2454_v1  ;;  %v2494_v14 = vld [vmem:[#allocation2 + $0x90] sm:$0xff]  ;;  %v2497_v15 = vld [vmem:[#allocation2 + $0xb8] sm:$0xff]  ;;  %v2500_v16 = vld [vmem:[#allocation2 + $0xa0] sm:$0xff] }
  0x30   :  { %431 = vmatpush1.bf16.msra.mxu1 %v2458_v2  ;;  %v2502_v17 = vld [vmem:[#allocation2 + $0xc8] sm:$0xff]  ;;  %v2506_v18 = vld [vmem:[#allocation2 + $0xb0] sm:$0xff]  ;;  %v2509_v19 = vld [vmem:[#allocation2 + $0xd8] sm:$0xff] }
  0x31   :  { %432 = vmatprep.subr.bf16.mxu1 %v2461_v3  ;;  %v2512_v20 = vld [vmem:[#allocation2 + $0xc0] sm:$0xff]  ;;  %v2514_v21 = vld [vmem:[#allocation2 + $0xe8] sm:$0xff]  ;;  %v2518_v22 = vld [vmem:[#allocation2 + $0xd0] sm:$0xff] }
  0x32   :  { %390 = vmatpush1.bf16.msra.mxu0 %v2464_v4  ;;  %v328_v23 = vld [vmem:[%s3047_s1] sm:$0xff]  ;;  %v329_v24 = vld [vmem:[%s3047_s1 + $0x8] sm:$0xff]  ;;  %v2527_v25 = vld [vmem:[#allocation2 + $0xf8] sm:$0xff] }
  0x33   :  { %391 = vmatprep.subr.bf16.mxu0 %v2466_v5  ;;  %v2530_v26 = vld [vmem:[#allocation2 + $0xe0] sm:$0xff]  ;;  %v352_v27 = vpack.c.bf16 %v329_v24, %v328_v23  ;;  %v2534_v28 = vld [vmem:[#allocation2 + $0xf0] sm:$0xff]  ;;  %v341_v36 = vld [vmem:[%s3046_s0 + $0x8] sm:$0xff] }
  0x34   :  { %433 = vmatpush1.bf16.msra.mxu1 %v2470_v6  ;;  %v340_v29 = vld [vmem:[%s3046_s0] sm:$0xff]  ;;  %v342_v30 = vld [vmem:[%s3046_s0 + $0x10] sm:$0xff]  ;;  %v343_v42 = vld [vmem:[%s3046_s0 + $0x18] sm:$0xff]  ;;  %v347_v46 = vunpack.c.h.bf16 %v341_v36  ;;  %v346_v55 = vunpack.c.l.bf16 %v341_v36 }
  0x35   :  { %434 = vmatprep.subr.bf16.mxu1 %v2473_v7  ;;  %v344_v31 = vunpack.c.l.bf16 %v340_v29  ;;  %v345_v32 = vunpack.c.h.bf16 %v340_v29  ;;  %v348_v33 = vunpack.c.l.bf16 %v342_v30  ;;  %v349_v35 = vunpack.c.h.bf16 %v342_v30 }
  0x36   :  { %392 = vmatpush1.bf16.msra.mxu0 %v2476_v8  ;;  %v351_v52 = vunpack.c.h.bf16 %v343_v42  ;;  %v350_v23 = vunpack.c.l.bf16 %v343_v42 }
  0x37   :  { %393 = vmatprep.subr.bf16.mxu0 %v2478_v9 }
  0x38   :  { %435 = vmatpush1.bf16.msra.mxu1 %v2482_v10 }
  0x39   :  { %436 = vmatprep.subr.bf16.mxu1 %v2485_v11 }
  0x3a   :  { %394 = vmatpush1.bf16.msra.mxu0 %v2488_v12 }
  0x3b   :  { %395 = vmatprep.subr.bf16.mxu0 %v2490_v13 }
  0x3c   :  { %437 = vmatpush1.bf16.msra.mxu1 %v2494_v14 }
  0x3d   :  { %438 = vmatprep.subr.bf16.mxu1 %v2497_v15 }
  0x3e   :  { %396 = vmatpush1.bf16.msra.mxu0 %v2500_v16 }
  0x3f   :  { %397 = vmatprep.subr.bf16.mxu0 %v2502_v17 }
  0x40   :  { %439 = vmatpush1.bf16.msra.mxu1 %v2506_v18 }
  0x41   :  { %440 = vmatprep.subr.bf16.mxu1 %v2509_v19 }
  0x42   :  { %398 = vmatpush1.bf16.msra.mxu0 %v2512_v20 }
  0x43   :  { %399 = vmatprep.subr.bf16.mxu0 %v2514_v21 }
  0x44   :  { %441 = vmatpush1.bf16.msra.mxu1 %v2518_v22 }
  0x45   :  { %442 = vmatprep.subr.bf16.mxu1 %v2527_v25 }
  0x46   :  { %400 = vmatpush1.bf16.msra.mxu0 %v2530_v26 }
  0x47   :  { %575 = vmatprep.subr.bf16.mxu0 %v2434_v57 }
  0x48   :  { %443 = vmatpush1.bf16.msra.mxu1 %v2534_v28 }
  0x49   :  { %418 = vmatmul.mubr.bf16.vlgmr.msra.gmra.mrb[0].mxu0 %v352_v27  ;;  %618 = vmatprep.subr.bf16.mxu1 %v2443_v61 }
  0x4a   :  { %576 = vmatpush1.bf16.msra.mxu0 %v2436_v58  ;;  %607 = vmatprep.mubr.bf16.mxu0 %v2237_v60 }
  0x4b   :  { %461 = vmatmul.mubr.bf16.vlgmr.msra.gmra.mrb[0].mxu1 %v352_v27  ;;  %577 = vmatprep.subr.bf16.mxu0 %v2438_v59 }
  0x4c   :  { %619 = vmatpush1.bf16.msra.mxu1 %v2450_v63  ;;  %650 = vmatprep.mubr.bf16.mxu1 %v2237_v60 }
  0x4d   :  { %620 = vmatprep.subr.bf16.mxu1 %v2452_v0 }
  0x4e   :  { %578 = vmatpush1.bf16.msra.mxu0 %v2447_v62 }
  0x4f   :  { %579 = vmatprep.subr.bf16.mxu0 %v2454_v1 }
  0x50   :  { %621 = vmatpush1.bf16.msra.mxu1 %v2458_v2 }
  0x51   :  { %622 = vmatprep.subr.bf16.mxu1 %v2461_v3 }
  0x52   :  { %580 = vmatpush1.bf16.msra.mxu0 %v2464_v4 }
  0x53   :  { %581 = vmatprep.subr.bf16.mxu0 %v2466_v5 }
  0x54   :  { %623 = vmatpush1.bf16.msra.mxu1 %v2470_v6 }
  0x55   :  { %624 = vmatprep.subr.bf16.mxu1 %v2473_v7 }
  0x56   :  { %582 = vmatpush1.bf16.msra.mxu0 %v2476_v8 }
  0x57   :  { %583 = vmatprep.subr.bf16.mxu0 %v2478_v9 }
  0x58   :  { %625 = vmatpush1.bf16.msra.mxu1 %v2482_v10 }
  0x59   :  { %626 = vmatprep.subr.bf16.mxu1 %v2485_v11 }
  0x5a   :  { %584 = vmatpush1.bf16.msra.mxu0 %v2488_v12 }
  0x5b   :  { %585 = vmatprep.subr.bf16.mxu0 %v2490_v13 }
  0x5c   :  { %627 = vmatpush1.bf16.msra.mxu1 %v2494_v14 }
  0x5d   :  { %628 = vmatprep.subr.bf16.mxu1 %v2497_v15 }
  0x5e   :  { %586 = vmatpush1.bf16.msra.mxu0 %v2500_v16 }
  0x5f   :  { %587 = vmatprep.subr.bf16.mxu0 %v2502_v17 }
  0x60   :  { %629 = vmatpush1.bf16.msra.mxu1 %v2506_v18 }
  0x61   :  { %630 = vmatprep.subr.bf16.mxu1 %v2509_v19 }
  0x62   :  { %588 = vmatpush1.bf16.msra.mxu0 %v2512_v20 }
  0x63   :  { %589 = vmatprep.subr.bf16.mxu0 %v2514_v21 }
  0x64   :  { %631 = vmatpush1.bf16.msra.mxu1 %v2518_v22 }
  0x65   :  { %632 = vmatprep.subr.bf16.mxu1 %v2527_v25 }
  0x66   :  { %590 = vmatpush1.bf16.msra.mxu0 %v2530_v26 }
  0x67   :  { %766 = vmatprep.subr.bf16.mxu0 %v2434_v57 }
  0x68   :  { %633 = vmatpush1.bf16.msra.mxu1 %v2534_v28 }
  0x69   :  { %809 = vmatprep.subr.bf16.mxu1 %v2443_v61 }
 0x11c   :  { %v419_v34 = vpop.f32.mrb[0].mxu0 }
 0x11d   :  { %v471_v37 = vadd.f32 %v419_v34, %v344_v31  ;;  %v421_v38 = vpop.f32.mrb[1].mxu0 }
 0x11e   :  { %v472_v39 = vadd.f32 %v421_v38, %v345_v32  ;;  %v423_v40 = vpop.f32.mrb[2].mxu0  ;;  %v462_v41 = vpop.f32.mrb[0].mxu1 }
 0x11f   :  { %v1888_v43 = vmul.f32 -1.442695, %v471_v37  ;;  %v475_v44 = vadd.f32 %v423_v40, %v348_v33  ;;  %v425_v45 = vpop.f32.mrb[3].mxu0  ;;  %v464_v47 = vpop.f32.mrb[1].mxu1  ;;  %v473_v27 = vadd.f32 %v462_v41, %v346_v55 }
 0x120   :  { %v1890_v48 = vmul.f32 -1.442695, %v472_v39  ;;  %v476_v49 = vadd.f32 %v425_v45, %v349_v35  ;;  %v466_v50 = vpop.f32.mrb[2].mxu1  ;;  %v474_v56 = vadd.f32 %v464_v47, %v347_v46 }
 0x121   :  { %1979 = vpow2.f32 %v1888_v43  ;;  %v1889_v51 = vmul.f32 -1.442695, %v475_v44  ;;  %v468_v53 = vpop.f32.mrb[3].mxu1  ;;  %v477_v30 = vadd.f32 %v466_v50, %v350_v23  ;;  %v332_v44 = vld [vmem:[%s3048_s2] sm:$0xff] }
 0x122   :  { %1981 = vpow2.f32 %v1890_v48  ;;  %v1891_v54 = vmul.f32 -1.442695, %v476_v49  ;;  %v478_v24 = vadd.f32 %v468_v53, %v351_v52  ;;  %v1892_v29 = vmul.f32 -1.442695, %v474_v56  ;;  %v333_v48 = vld [vmem:[%s3048_s2 + $0x8] sm:$0xff] }
 0x123   :  { %1983 = vpow2.f32 %v1889_v51 }
 0x124   :  { %1985 = vpow2.f32 %v1891_v54  ;;  %v1893_v31 = vmul.f32 -1.442695, %v478_v24 }
 0x125   :  { %1987 = vtanh.f32 %v473_v27 }
 0x126   :  { %1989 = vpow2.f32 %v1892_v29 }
 0x127   :  { %1991 = vtanh.f32 %v477_v30 }
 0x128   :  { %1993 = vpow2.f32 %v1893_v31 }
 0x12b   :  { %v1980_v32 = vpop.eup %1979 }
 0x12c   :  { %v1982_v33 = vpop.eup %1981  ;;  %v485_v34 = vadd.f32 1.0, %v1980_v32 }
 0x12d   :  { %v1984_v35 = vpop.eup %1983  ;;  %v497_v37 = vadd.f32 1.0, %v1982_v33 }
 0x12e   :  { %v1986_v38 = vpop.eup %1985  ;;  %1995 = vrcp.f32 %v485_v34  ;;  %v486_v36 = vadd.f32 1.0, %v1984_v35  ;;  %v1894_v34 = vld [vmem:[%s3046_s0 + $0x20] sm:$0xff]  ;;  %v1896_v35 = vld [vmem:[%s3046_s0 + $0x30] sm:$0xff] }
 0x12f   :  { %1997 = vrcp.f32 %v497_v37  ;;  %v498_v39 = vadd.f32 1.0, %v1986_v38  ;;  %v1988_v40 = vpop.eup %1987  ;;  %v534_v37 = vunpack.c.l.bf16 %v1894_v34  ;;  %v535_v38 = vunpack.c.h.bf16 %v1894_v34 }
 0x130   :  { %1999 = vrcp.f32 %v486_v36  ;;  %v1990_v41 = vpop.eup %1989  ;;  %v538_v36 = vunpack.c.l.bf16 %v1896_v35 }
 0x131   :  { %2001 = vrcp.f32 %v498_v39  ;;  %v1992_v42 = vpop.eup %1991  ;;  %v511_v46 = vadd.f32 1.0, %v1990_v41  ;;  %v539_v41 = vunpack.c.h.bf16 %v1896_v35 }
 0x132   :  { %v1994_v43 = vpop.eup %1993 }
 0x133   :  { %v512_v54 = vadd.f32 1.0, %v1994_v43  ;;  %2003 = vrcp.f32 %v511_v46 }
 0x138   :  { %v1996_v45 = vpop.eup %1995 }
 0x139   :  { %v1998_v47 = vpop.eup %1997  ;;  %v519_v49 = vmul.f32 %v1996_v45, %v1988_v40 }
 0x13a   :  { %v2000_v50 = vpop.eup %1999  ;;  %v517_v51 = vmul.f32 %v1998_v47, %v332_v44 }
 0x13b   :  { %v2002_v52 = vpop.eup %2001  ;;  %v520_v53 = vmul.f32 %v2000_v50, %v1992_v42 }
 0x13c   :  { %v518_v55 = vmul.f32 %v2002_v52, %v333_v48  ;;  %v2592_v56 = vadd.f32 %v519_v49, %v517_v51 }
 0x13d   :  { %v2004_v24 = vpop.eup %2003 }
 0x13e   :  { %2005 = vtanh.f32 %v2592_v56  ;;  %v2595_v23 = vadd.f32 %v520_v53, %v518_v55  ;;  %v1897_v55 = vld [vmem:[%s3046_s0 + $0x38] sm:$0xff] }
 0x13f   :  { %2007 = vrcp.f32 %v512_v54 }
 0x140   :  { %2009 = vtanh.f32 %v2595_v23 }
 0x148   :  { %v2006_v27 = vpop.eup %2005 }
 0x149   :  { %v2008_v29 = vpop.eup %2007  ;;  %v525_v30 = vmul.f32 %v2006_v27, %v2004_v24 }
 0x14a   :  { %v2010_v31 = vpop.eup %2009 }
 0x14b   :  { %v526_v32 = vmul.f32 %v2010_v31, %v2008_v29  ;;  %527 = vst [vmem:[%s3050_s4] sm:$0xff] %v525_v30  ;;  %v540_v31 = vunpack.c.l.bf16 %v1897_v55 }
 0x14d   :  { %528 = vst [vmem:[%s3050_s4 + $0x8] sm:$0xff] %v526_v32  ;;  %v542_v33 = vpack.c.bf16 %v526_v32, %v525_v30  ;;  %v541_v30 = vunpack.c.h.bf16 %v1897_v55 }
 0x14f   :  { %608 = vmatmul.mubr.bf16.vlgmr.msra.gmra.mrb[4].mxu0 %v542_v33  ;;  %651 = vmatmul.mubr.bf16.vlgmr.msra.gmra.mrb[4].mxu1 %v542_v33 }
 0x150   :  { %767 = vmatpush1.bf16.msra.mxu0 %v2436_v58  ;;  %810 = vmatpush1.bf16.msra.mxu1 %v2450_v63 }
 0x151   :  { %768 = vmatprep.subr.bf16.mxu0 %v2438_v59  ;;  %811 = vmatprep.subr.bf16.mxu1 %v2452_v0 }
 0x152   :  { %798 = vmatprep.mubr.bf16.mxu0 %v2237_v60  ;;  %841 = vmatprep.mubr.bf16.mxu1 %v2237_v60 }
 0x154   :  { %769 = vmatpush1.bf16.msra.mxu0 %v2447_v62  ;;  %812 = vmatpush1.bf16.msra.mxu1 %v2458_v2 }
 0x155   :  { %770 = vmatprep.subr.bf16.mxu0 %v2454_v1  ;;  %813 = vmatprep.subr.bf16.mxu1 %v2461_v3 }
 0x158   :  { %771 = vmatpush1.bf16.msra.mxu0 %v2464_v4  ;;  %814 = vmatpush1.bf16.msra.mxu1 %v2470_v6 }
 0x159   :  { %772 = vmatprep.subr.bf16.mxu0 %v2466_v5  ;;  %815 = vmatprep.subr.bf16.mxu1 %v2473_v7 }
 0x15c   :  { %773 = vmatpush1.bf16.msra.mxu0 %v2476_v8  ;;  %816 = vmatpush1.bf16.msra.mxu1 %v2482_v10 }
 0x15d   :  { %774 = vmatprep.subr.bf16.mxu0 %v2478_v9  ;;  %817 = vmatprep.subr.bf16.mxu1 %v2485_v11 }
 0x160   :  { %775 = vmatpush1.bf16.msra.mxu0 %v2488_v12  ;;  %818 = vmatpush1.bf16.msra.mxu1 %v2494_v14 }
 0x161   :  { %776 = vmatprep.subr.bf16.mxu0 %v2490_v13  ;;  %819 = vmatprep.subr.bf16.mxu1 %v2497_v15 }
 0x164   :  { %777 = vmatpush1.bf16.msra.mxu0 %v2500_v16  ;;  %820 = vmatpush1.bf16.msra.mxu1 %v2506_v18 }
 0x165   :  { %778 = vmatprep.subr.bf16.mxu0 %v2502_v17  ;;  %821 = vmatprep.subr.bf16.mxu1 %v2509_v19 }
 0x168   :  { %779 = vmatpush1.bf16.msra.mxu0 %v2512_v20  ;;  %822 = vmatpush1.bf16.msra.mxu1 %v2518_v22 }
 0x169   :  { %780 = vmatprep.subr.bf16.mxu0 %v2514_v21  ;;  %823 = vmatprep.subr.bf16.mxu1 %v2527_v25 }
 0x16c   :  { %781 = vmatpush1.bf16.msra.mxu0 %v2530_v26  ;;  %824 = vmatpush1.bf16.msra.mxu1 %v2534_v28 }
 0x16d   :  { %957 = vmatprep.subr.bf16.mxu0 %v2434_v57  ;;  %1000 = vmatprep.subr.bf16.mxu1 %v2443_v61  ;;  %v1895_v57 = vld [vmem:[%s3046_s0 + $0x28] sm:$0xff] }
 0x16e   :  { %v537_v52 = vunpack.c.h.bf16 %v1895_v57  ;;  %v536_v27 = vunpack.c.l.bf16 %v1895_v57 }
 0x222   :  { %v609_v39 = vpop.f32.mrb[4].mxu0  ;;  %v652_v40 = vpop.f32.mrb[4].mxu1 }
 0x223   :  { %v661_v42 = vadd.f32 %v609_v39, %v534_v37  ;;  %v611_v61 = vpop.f32.mrb[5].mxu0  ;;  %v654_v43 = vpop.f32.mrb[5].mxu1  ;;  %v663_v32 = vadd.f32 %v652_v40, %v536_v27 }
 0x224   :  { %v662_v44 = vadd.f32 %v611_v61, %v535_v38  ;;  %v613_v45 = vpop.f32.mrb[6].mxu0  ;;  %v656_v46 = vpop.f32.mrb[6].mxu1  ;;  %v664_v29 = vadd.f32 %v654_v43, %v537_v52 }
 0x225   :  { %v1898_v47 = vmul.f32 -1.442695, %v661_v42  ;;  %v665_v48 = vadd.f32 %v613_v45, %v538_v36  ;;  %v615_v49 = vpop.f32.mrb[7].mxu0  ;;  %v658_v50 = vpop.f32.mrb[7].mxu1  ;;  %v667_v35 = vadd.f32 %v656_v46, %v540_v31 }
 0x226   :  { %v1900_v51 = vmul.f32 -1.442695, %v662_v44  ;;  %v666_v53 = vadd.f32 %v615_v49, %v539_v41  ;;  %v1902_v33 = vmul.f32 -1.442695, %v664_v29  ;;  %v668_v34 = vadd.f32 %v658_v50, %v541_v30 }
 0x227   :  { %2011 = vpow2.f32 %v1898_v47  ;;  %v1899_v54 = vmul.f32 -1.442695, %v665_v48 }
 0x228   :  { %2013 = vpow2.f32 %v1900_v51  ;;  %v1901_v24 = vmul.f32 -1.442695, %v666_v53  ;;  %v1903_v39 = vmul.f32 -1.442695, %v668_v34 }
 0x229   :  { %2015 = vpow2.f32 %v1899_v54 }
 0x22a   :  { %2017 = vpow2.f32 %v1901_v24 }
 0x22b   :  { %2019 = vtanh.f32 %v663_v32 }
 0x22c   :  { %2021 = vpow2.f32 %v1902_v33 }
 0x22d   :  { %2023 = vtanh.f32 %v667_v35 }
 0x231   :  { %v2012_v37 = vpop.eup %2011 }
 0x232   :  { %v2014_v38 = vpop.eup %2013  ;;  %v675_v36 = vadd.f32 1.0, %v2012_v37 }
 0x233   :  { %v687_v41 = vadd.f32 1.0, %v2014_v38  ;;  %v2016_v42 = vpop.eup %2015 }
 0x234   :  { %2025 = vrcp.f32 %v675_v36  ;;  %v676_v57 = vadd.f32 1.0, %v2016_v42  ;;  %v2018_v61 = vpop.eup %2017 }
 0x235   :  { %2027 = vrcp.f32 %v687_v41  ;;  %v688_v43 = vadd.f32 1.0, %v2018_v61  ;;  %v2020_v40 = vpop.eup %2019 }
 0x236   :  { %2029 = vpow2.f32 %v1903_v39  ;;  %v2022_v44 = vpop.eup %2021 }
 0x237   :  { %2031 = vrcp.f32 %v676_v57  ;;  %v2024_v45 = vpop.eup %2023  ;;  %v701_v49 = vadd.f32 1.0, %v2022_v44 }
 0x238   :  { %2033 = vrcp.f32 %v688_v43 }
 0x239   :  { %2035 = vrcp.f32 %v701_v49 }
 0x23e   :  { %v2026_v46 = vpop.eup %2025 }
 0x23f   :  { %v2028_v47 = vpop.eup %2027  ;;  %v709_v48 = vmul.f32 %v2026_v46, %v2020_v40 }
 0x240   :  { %v2030_v50 = vpop.eup %2029  ;;  %v707_v51 = vmul.f32 %v2028_v47, %v2592_v56 }
 0x241   :  { %v2032_v52 = vpop.eup %2031  ;;  %v702_v24 = vadd.f32 1.0, %v2030_v50 }
 0x242   :  { %v2651_v53 = vadd.f32 %v709_v48, %v707_v51  ;;  %v710_v54 = vmul.f32 %v2032_v52, %v2024_v45  ;;  %v2034_v55 = vpop.eup %2033 }
 0x243   :  { %v708_v27 = vmul.f32 %v2034_v55, %v2595_v23  ;;  %v2036_v30 = vpop.eup %2035 }
 0x244   :  { %2037 = vtanh.f32 %v2651_v53 }
 0x245   :  { %v2655_v29 = vadd.f32 %v710_v54, %v708_v27  ;;  %2039 = vrcp.f32 %v702_v24 }
 0x247   :  { %2041 = vtanh.f32 %v2655_v29 }
 0x24e   :  { %v2038_v31 = vpop.eup %2037 }
 0x24f   :  { %v715_v32 = vmul.f32 %v2038_v31, %v2036_v30  ;;  %v2040_v56 = vpop.eup %2039 }
 0x251   :  { %1904 = vst [vmem:[%s3050_s4 + $0x10] sm:$0xff] %v715_v32  ;;  %v2042_v33 = vpop.eup %2041 }
 0x252   :  { %v716_v34 = vmul.f32 %v2042_v33, %v2040_v56 }
 0x254   :  { %1905 = vst [vmem:[%s3050_s4 + $0x18] sm:$0xff] %v716_v34  ;;  %v733_v23 = vpack.c.bf16 %v716_v34, %v715_v32 }
 0x256   :  { %799 = vmatmul.mubr.bf16.vlgmr.msra.gmra.mrb[8].mxu0 %v733_v23  ;;  %842 = vmatmul.mubr.bf16.vlgmr.msra.gmra.mrb[8].mxu1 %v733_v23 }
 0x257   :  { %958 = vmatpush1.bf16.msra.mxu0 %v2436_v58  ;;  %1001 = vmatpush1.bf16.msra.mxu1 %v2450_v63  ;;  %v1906_v58 = vld [vmem:[%s3046_s0 + $0x40] sm:$0xff] }
 0x258   :  { %959 = vmatprep.subr.bf16.mxu0 %v2438_v59  ;;  %1002 = vmatprep.subr.bf16.mxu1 %v2452_v0  ;;  %v1908_v59 = vld [vmem:[%s3046_s0 + $0x50] sm:$0xff]  ;;  %v726_v63 = vunpack.c.h.bf16 %v1906_v58 }
 0x259   :  { %989 = vmatprep.mubr.bf16.mxu0 %v2237_v60  ;;  %1032 = vmatprep.mubr.bf16.mxu1 %v2237_v60  ;;  %v729_v0 = vunpack.c.l.bf16 %v1908_v59 }
 0x25b   :  { %960 = vmatpush1.bf16.msra.mxu0 %v2447_v62  ;;  %1003 = vmatpush1.bf16.msra.mxu1 %v2458_v2  ;;  %v725_v62 = vunpack.c.l.bf16 %v1906_v58 }
 0x25c   :  { %961 = vmatprep.subr.bf16.mxu0 %v2454_v1  ;;  %1004 = vmatprep.subr.bf16.mxu1 %v2461_v3  ;;  %v730_v3 = vunpack.c.h.bf16 %v1908_v59 }
 0x25f   :  { %962 = vmatpush1.bf16.msra.mxu0 %v2464_v4  ;;  %1005 = vmatpush1.bf16.msra.mxu1 %v2470_v6 }
 0x260   :  { %963 = vmatprep.subr.bf16.mxu0 %v2466_v5  ;;  %1006 = vmatprep.subr.bf16.mxu1 %v2473_v7  ;;  %v1907_v5 = vld [vmem:[%s3046_s0 + $0x48] sm:$0xff] }
 0x263   :  { %964 = vmatpush1.bf16.msra.mxu0 %v2476_v8  ;;  %1007 = vmatpush1.bf16.msra.mxu1 %v2482_v10 }
 0x264   :  { %965 = vmatprep.subr.bf16.mxu0 %v2478_v9  ;;  %1008 = vmatprep.subr.bf16.mxu1 %v2485_v11 }
 0x267   :  { %966 = vmatpush1.bf16.msra.mxu0 %v2488_v12  ;;  %1009 = vmatpush1.bf16.msra.mxu1 %v2494_v14 }
 0x268   :  { %967 = vmatprep.subr.bf16.mxu0 %v2490_v13  ;;  %1010 = vmatprep.subr.bf16.mxu1 %v2497_v15 }
 0x26b   :  { %968 = vmatpush1.bf16.msra.mxu0 %v2500_v16  ;;  %1011 = vmatpush1.bf16.msra.mxu1 %v2506_v18  ;;  %v728_v16 = vunpack.c.h.bf16 %v1907_v5 }
 0x26c   :  { %969 = vmatprep.subr.bf16.mxu0 %v2502_v17  ;;  %1012 = vmatprep.subr.bf16.mxu1 %v2509_v19  ;;  %v1909_v19 = vld [vmem:[%s3046_s0 + $0x58] sm:$0xff] }
 0x26f   :  { %970 = vmatpush1.bf16.msra.mxu0 %v2512_v20  ;;  %1013 = vmatpush1.bf16.msra.mxu1 %v2518_v22 }
 0x270   :  { %971 = vmatprep.subr.bf16.mxu0 %v2514_v21  ;;  %1014 = vmatprep.subr.bf16.mxu1 %v2527_v25  ;;  %v727_v21 = vunpack.c.l.bf16 %v1907_v5  ;;  %v732_v25 = vunpack.c.h.bf16 %v1909_v19  ;;  %v2744_v5 = vld [vmem:[#allocation2 + $0x30] sm:$0xff] }
 0x273   :  { %972 = vmatpush1.bf16.msra.mxu0 %v2530_v26  ;;  %1015 = vmatpush1.bf16.msra.mxu1 %v2534_v28  ;;  %v731_v26 = vunpack.c.l.bf16 %v1909_v19  ;;  %v2784_v19 = vld [vmem:[#allocation2 + $0xb8] sm:$0xff] }
 0x329   :  { %v800_v1 = vpop.f32.mrb[8].mxu0  ;;  %v843_v2 = vpop.f32.mrb[8].mxu1 }
 0x32a   :  { %v852_v4 = vadd.f32 %v800_v1, %v725_v62  ;;  %v802_v6 = vpop.f32.mrb[9].mxu0  ;;  %v845_v7 = vpop.f32.mrb[9].mxu1  ;;  %v854_v28 = vadd.f32 %v843_v2, %v727_v21  ;;  %v2724_v62 = vld [vmem:[#allocation2 + $0x8] sm:$0xff]  ;;  %v2732_v1 = vld [vmem:[#allocation2 + $0x10] sm:$0xff] }
 0x32b   :  { %v853_v8 = vadd.f32 %v802_v6, %v726_v63  ;;  %v804_v9 = vpop.f32.mrb[10].mxu0  ;;  %v847_v10 = vpop.f32.mrb[10].mxu1  ;;  %v855_v22 = vadd.f32 %v845_v7, %v728_v16  ;;  %v2726_v63 = vld [vmem:[#allocation2 + $0x18] sm:$0xff]  ;;  %1148 = vmatprep.subr.bf16.mxu0 %v2724_v62  ;;  %v2736_v2 = vld [vmem:[#allocation2 + $0x28] sm:$0xff]  ;;  %v2776_v16 = vld [vmem:[#allocation2 + $0x80] sm:$0xff] }
 0x32c   :  { %v1910_v11 = vmul.f32 -1.442695, %v852_v4  ;;  %v856_v12 = vadd.f32 %v804_v9, %v729_v0  ;;  %v806_v13 = vpop.f32.mrb[11].mxu0  ;;  %v849_v14 = vpop.f32.mrb[11].mxu1  ;;  %v858_v38 = vadd.f32 %v847_v10, %v731_v26  ;;  %1191 = vmatprep.subr.bf16.mxu1 %v2726_v63  ;;  %v2730_v0 = vld [vmem:[#allocation2] sm:$0xff]  ;;  %v2748_v6 = vld [vmem:[#allocation2 + $0x48] sm:$0xff] }
 0x32d   :  { %v1912_v15 = vmul.f32 -1.442695, %v853_v8  ;;  %v857_v17 = vadd.f32 %v806_v13, %v730_v3  ;;  %v1914_v35 = vmul.f32 -1.442695, %v855_v22  ;;  %v859_v37 = vadd.f32 %v849_v14, %v732_v25  ;;  %v2738_v3 = vld [vmem:[#allocation2 + $0x38] sm:$0xff]  ;;  %v2742_v4 = vld [vmem:[#allocation2 + $0x20] sm:$0xff] }
 0x32e   :  { %2043 = vpow2.f32 %v1910_v11  ;;  %v1911_v18 = vmul.f32 -1.442695, %v856_v12  ;;  %v2750_v7 = vld [vmem:[#allocation2 + $0x58] sm:$0xff]  ;;  %v2754_v8 = vld [vmem:[#allocation2 + $0x40] sm:$0xff]  ;;  %v2756_v9 = vld [vmem:[#allocation2 + $0x50] sm:$0xff] }
 0x32f   :  { %2045 = vpow2.f32 %v1912_v15  ;;  %v1913_v20 = vmul.f32 -1.442695, %v857_v17  ;;  %v1915_v42 = vmul.f32 -1.442695, %v859_v37  ;;  %v2760_v10 = vld [vmem:[#allocation2 + $0x68] sm:$0xff]  ;;  %v2762_v11 = vld [vmem:[#allocation2 + $0x78] sm:$0xff] }
 0x330   :  { %2047 = vpow2.f32 %v1911_v18  ;;  %v2766_v12 = vld [vmem:[#allocation2 + $0x60] sm:$0xff]  ;;  %v2768_v13 = vld [vmem:[#allocation2 + $0x70] sm:$0xff]  ;;  %v2772_v14 = vld [vmem:[#allocation2 + $0x88] sm:$0xff] }
 0x331   :  { %2049 = vpow2.f32 %v1913_v20  ;;  %v2774_v15 = vld [vmem:[#allocation2 + $0x98] sm:$0xff]  ;;  %v2780_v17 = vld [vmem:[#allocation2 + $0x90] sm:$0xff]  ;;  %v2782_v18 = vld [vmem:[#allocation2 + $0xa8] sm:$0xff] }
 0x332   :  { %2051 = vtanh.f32 %v854_v28  ;;  %v2790_v20 = vld [vmem:[#allocation2 + $0xa0] sm:$0xff]  ;;  %v2792_v21 = vld [vmem:[#allocation2 + $0xb0] sm:$0xff]  ;;  %v2794_v22 = vld [vmem:[#allocation2 + $0xc8] sm:$0xff] }
 0x333   :  { %2053 = vpow2.f32 %v1914_v35  ;;  %v2796_v25 = vld [vmem:[#allocation2 + $0xd8] sm:$0xff]  ;;  %v2802_v26 = vld [vmem:[#allocation2 + $0xc0] sm:$0xff]  ;;  %v2804_v28 = vld [vmem:[#allocation2 + $0xd0] sm:$0xff] }
 0x334   :  { %2055 = vtanh.f32 %v858_v38  ;;  %v2806_v35 = vld [vmem:[#allocation2 + $0xe8] sm:$0xff]  ;;  %v2808_v37 = vld [vmem:[#allocation2 + $0xf8] sm:$0xff]  ;;  %v2814_v38 = vld [vmem:[#allocation2 + $0xe0] sm:$0xff] }
 0x338   :  { %v2044_v36 = vpop.eup %2043 }
 0x339   :  { %v2046_v39 = vpop.eup %2045  ;;  %v866_v41 = vadd.f32 1.0, %v2044_v36  ;;  %v2816_v36 = vld [vmem:[#allocation2 + $0xf0] sm:$0xff] }
 0x33a   :  { %v878_v57 = vadd.f32 1.0, %v2046_v39  ;;  %v2048_v61 = vpop.eup %2047  ;;  %v1918_v39 = vld [vmem:[%s3046_s0 + $0x60] sm:$0xff] }
 0x33b   :  { %2057 = vrcp.f32 %v866_v41  ;;  %v867_v43 = vadd.f32 1.0, %v2048_v61  ;;  %v2050_v40 = vpop.eup %2049  ;;  %v1920_v41 = vld [vmem:[%s3046_s0 + $0x70] sm:$0xff] }
 0x33c   :  { %2059 = vrcp.f32 %v878_v57  ;;  %v879_v44 = vadd.f32 1.0, %v2050_v40  ;;  %v2052_v45 = vpop.eup %2051  ;;  %v917_v57 = vunpack.c.h.bf16 %v1918_v39  ;;  %v920_v61 = vunpack.c.l.bf16 %v1920_v41 }
 0x33d   :  { %2061 = vpow2.f32 %v1915_v42  ;;  %v2054_v46 = vpop.eup %2053  ;;  %v916_v42 = vunpack.c.l.bf16 %v1918_v39 }
 0x33e   :  { %2063 = vrcp.f32 %v867_v43  ;;  %v2056_v47 = vpop.eup %2055  ;;  %v892_v51 = vadd.f32 1.0, %v2054_v46  ;;  %v1919_v46 = vld [vmem:[%s3046_s0 + $0x68] sm:$0xff] }
 0x33f   :  { %2065 = vrcp.f32 %v879_v44  ;;  %v921_v44 = vunpack.c.h.bf16 %v1920_v41 }
 0x340   :  { %2067 = vrcp.f32 %v892_v51 }
 0x345   :  { %v2058_v48 = vpop.eup %2057 }
 0x346   :  { %v2060_v49 = vpop.eup %2059  ;;  %v900_v50 = vmul.f32 %v2058_v48, %v2052_v45 }
 0x347   :  { %v2062_v52 = vpop.eup %2061  ;;  %v898_v54 = vmul.f32 %v2060_v49, %v2651_v53 }
 0x348   :  { %v2064_v55 = vpop.eup %2063  ;;  %v893_v31 = vadd.f32 1.0, %v2062_v52 }
 0x349   :  { %v2709_v24 = vadd.f32 %v900_v50, %v898_v54  ;;  %v901_v27 = vmul.f32 %v2064_v55, %v2056_v47  ;;  %v2066_v30 = vpop.eup %2065 }
 0x34a   :  { %v899_v32 = vmul.f32 %v2066_v30, %v2655_v29  ;;  %v2068_v33 = vpop.eup %2067 }
 0x34b   :  { %2069 = vtanh.f32 %v2709_v24 }
 0x34c   :  { %v2713_v56 = vadd.f32 %v901_v27, %v899_v32  ;;  %2071 = vrcp.f32 %v893_v31  ;;  %v919_v31 = vunpack.c.h.bf16 %v1919_v46 }
 0x34e   :  { %2073 = vtanh.f32 %v2713_v56 }
 0x355   :  { %v2070_v34 = vpop.eup %2069 }
 0x356   :  { %v906_v23 = vmul.f32 %v2070_v34, %v2068_v33  ;;  %v2072_v53 = vpop.eup %2071  ;;  %v1921_v34 = vld [vmem:[%s3046_s0 + $0x78] sm:$0xff] }
 0x358   :  { %1916 = vst [vmem:[%s3050_s4 + $0x20] sm:$0xff] %v906_v23  ;;  %v2074_v58 = vpop.eup %2073 }
 0x359   :  { %v907_v59 = vmul.f32 %v2074_v58, %v2072_v53  ;;  %v918_v53 = vunpack.c.l.bf16 %v1919_v46 }
 0x35b   :  { %1917 = vst [vmem:[%s3050_s4 + $0x28] sm:$0xff] %v907_v59  ;;  %v924_v29 = vpack.c.bf16 %v907_v59, %v906_v23  ;;  %v923_v59 = vunpack.c.h.bf16 %v1921_v34 }
 0x35d   :  { %990 = vmatmul.mubr.bf16.vlgmr.msra.gmra.mrb[12].mxu0 %v924_v29  ;;  %1033 = vmatmul.mubr.bf16.vlgmr.msra.gmra.mrb[12].mxu1 %v924_v29  ;;  %v922_v29 = vunpack.c.l.bf16 %v1921_v34 }
 0x35e   :  { %1180 = vmatprep.mubr.bf16.mxu0 %v2237_v60  ;;  %1223 = vmatprep.mubr.bf16.mxu1 %v2237_v60 }
 0x35f   :  { %1149 = vmatpush1.bf16.msra.mxu0 %v2730_v0  ;;  %1192 = vmatpush1.bf16.msra.mxu1 %v2732_v1 }
 0x360   :  { %1150 = vmatprep.subr.bf16.mxu0 %v2736_v2  ;;  %1193 = vmatprep.subr.bf16.mxu1 %v2738_v3 }
 0x363   :  { %1151 = vmatpush1.bf16.msra.mxu0 %v2742_v4  ;;  %1194 = vmatpush1.bf16.msra.mxu1 %v2744_v5 }
 0x364   :  { %1152 = vmatprep.subr.bf16.mxu0 %v2748_v6  ;;  %1195 = vmatprep.subr.bf16.mxu1 %v2750_v7 }
 0x367   :  { %1153 = vmatpush1.bf16.msra.mxu0 %v2754_v8  ;;  %1196 = vmatpush1.bf16.msra.mxu1 %v2756_v9 }
 0x368   :  { %1154 = vmatprep.subr.bf16.mxu0 %v2760_v10  ;;  %1197 = vmatprep.subr.bf16.mxu1 %v2762_v11 }
 0x36b   :  { %1155 = vmatpush1.bf16.msra.mxu0 %v2766_v12  ;;  %1198 = vmatpush1.bf16.msra.mxu1 %v2768_v13 }
 0x36c   :  { %1156 = vmatprep.subr.bf16.mxu0 %v2772_v14  ;;  %1199 = vmatprep.subr.bf16.mxu1 %v2774_v15 }
 0x36f   :  { %1157 = vmatpush1.bf16.msra.mxu0 %v2776_v16  ;;  %1200 = vmatpush1.bf16.msra.mxu1 %v2780_v17 }
 0x370   :  { %1158 = vmatprep.subr.bf16.mxu0 %v2782_v18  ;;  %1201 = vmatprep.subr.bf16.mxu1 %v2784_v19 }
 0x373   :  { %1159 = vmatpush1.bf16.msra.mxu0 %v2790_v20  ;;  %1202 = vmatpush1.bf16.msra.mxu1 %v2792_v21 }
 0x374   :  { %1160 = vmatprep.subr.bf16.mxu0 %v2794_v22  ;;  %1203 = vmatprep.subr.bf16.mxu1 %v2796_v25 }
 0x377   :  { %1161 = vmatpush1.bf16.msra.mxu0 %v2802_v26  ;;  %1204 = vmatpush1.bf16.msra.mxu1 %v2804_v28 }
 0x378   :  { %1162 = vmatprep.subr.bf16.mxu0 %v2806_v35  ;;  %1205 = vmatprep.subr.bf16.mxu1 %v2808_v37 }
 0x37b   :  { %1163 = vmatpush1.bf16.msra.mxu0 %v2814_v38  ;;  %1206 = vmatpush1.bf16.msra.mxu1 %v2816_v36 }
 0x37c   :  { %1339 = vmatprep.subr.bf16.mxu0 %v2724_v62  ;;  %1382 = vmatprep.subr.bf16.mxu1 %v2726_v63 }
 0x430   :  { %v991_v43 = vpop.f32.mrb[12].mxu0  ;;  %v1034_v40 = vpop.f32.mrb[12].mxu1 }
 0x431   :  { %v1043_v45 = vadd.f32 %v991_v43, %v916_v42  ;;  %v993_v47 = vpop.f32.mrb[13].mxu0  ;;  %v1036_v48 = vpop.f32.mrb[13].mxu1  ;;  %v1045_v39 = vadd.f32 %v1034_v40, %v918_v53 }
 0x432   :  { %v1044_v49 = vadd.f32 %v993_v47, %v917_v57  ;;  %v995_v50 = vpop.f32.mrb[14].mxu0  ;;  %v1038_v51 = vpop.f32.mrb[14].mxu1  ;;  %v1046_v58 = vadd.f32 %v1036_v48, %v919_v31 }
 0x433   :  { %v1922_v52 = vmul.f32 -1.442695, %v1043_v45  ;;  %v1047_v54 = vadd.f32 %v995_v50, %v920_v61  ;;  %v997_v55 = vpop.f32.mrb[15].mxu0  ;;  %v1040_v27 = vpop.f32.mrb[15].mxu1  ;;  %v1049_v57 = vadd.f32 %v1038_v51, %v922_v29 }
 0x434   :  { %v1924_v30 = vmul.f32 -1.442695, %v1044_v49  ;;  %v1048_v32 = vadd.f32 %v997_v55, %v921_v44  ;;  %v1926_v41 = vmul.f32 -1.442695, %v1046_v58  ;;  %v1050_v42 = vadd.f32 %v1040_v27, %v923_v59 }
 0x435   :  { %2075 = vpow2.f32 %v1922_v52  ;;  %v1923_v33 = vmul.f32 -1.442695, %v1047_v54 }
 0x436   :  { %2077 = vpow2.f32 %v1924_v30  ;;  %v1925_v23 = vmul.f32 -1.442695, %v1048_v32  ;;  %v1927_v45 = vmul.f32 -1.442695, %v1050_v42 }
 0x437   :  { %2079 = vpow2.f32 %v1923_v33 }
 0x438   :  { %2081 = vpow2.f32 %v1925_v23 }
 0x439   :  { %2083 = vtanh.f32 %v1045_v39 }
 0x43a   :  { %2085 = vpow2.f32 %v1926_v41 }
 0x43b   :  { %2087 = vtanh.f32 %v1049_v57 }
 0x43f   :  { %v2076_v61 = vpop.eup %2075 }
 0x440   :  { %v2078_v43 = vpop.eup %2077  ;;  %v1057_v44 = vadd.f32 1.0, %v2076_v61 }
 0x441   :  { %v1069_v47 = vadd.f32 1.0, %v2078_v43  ;;  %v2080_v49 = vpop.eup %2079  ;;  %v1930_v43 = vld [vmem:[%s3046_s0 + $0x80] sm:$0xff] }
 0x442   :  { %2089 = vrcp.f32 %v1057_v44  ;;  %v1058_v46 = vadd.f32 1.0, %v2080_v49  ;;  %v2082_v48 = vpop.eup %2081  ;;  %v1932_v44 = vld [vmem:[%s3046_s0 + $0x90] sm:$0xff] }
 0x443   :  { %2091 = vrcp.f32 %v1069_v47  ;;  %v1070_v50 = vadd.f32 1.0, %v2082_v48  ;;  %v2084_v40 = vpop.eup %2083  ;;  %v1108_v47 = vunpack.c.h.bf16 %v1930_v43  ;;  %v1111_v49 = vunpack.c.l.bf16 %v1932_v44 }
 0x444   :  { %2093 = vpow2.f32 %v1927_v45  ;;  %v2086_v52 = vpop.eup %2085  ;;  %v1107_v45 = vunpack.c.l.bf16 %v1930_v43 }
 0x445   :  { %2095 = vrcp.f32 %v1058_v46  ;;  %v2088_v51 = vpop.eup %2087  ;;  %v1083_v30 = vadd.f32 1.0, %v2086_v52  ;;  %v1931_v52 = vld [vmem:[%s3046_s0 + $0x88] sm:$0xff] }
 0x446   :  { %2097 = vrcp.f32 %v1070_v50  ;;  %v1112_v50 = vunpack.c.h.bf16 %v1932_v44 }
 0x447   :  { %2099 = vrcp.f32 %v1083_v30 }
 0x44c   :  { %v2090_v54 = vpop.eup %2089 }
 0x44d   :  { %v2092_v55 = vpop.eup %2091  ;;  %v1091_v27 = vmul.f32 %v2090_v54, %v2084_v40 }
 0x44e   :  { %v2094_v31 = vpop.eup %2093  ;;  %v1089_v32 = vmul.f32 %v2092_v55, %v2709_v24 }
 0x44f   :  { %v2096_v33 = vpop.eup %2095  ;;  %v1084_v58 = vadd.f32 1.0, %v2094_v31 }
 0x450   :  { %v2835_v34 = vadd.f32 %v1091_v27, %v1089_v32  ;;  %v1092_v23 = vmul.f32 %v2096_v33, %v2088_v51  ;;  %v2098_v53 = vpop.eup %2097 }
 0x451   :  { %v1090_v59 = vmul.f32 %v2098_v53, %v2713_v56  ;;  %v2100_v39 = vpop.eup %2099 }
 0x452   :  { %2101 = vtanh.f32 %v2835_v34 }
 0x453   :  { %v2839_v29 = vadd.f32 %v1092_v23, %v1090_v59  ;;  %2103 = vrcp.f32 %v1084_v58  ;;  %v1110_v58 = vunpack.c.h.bf16 %v1931_v52 }
 0x455   :  { %2105 = vtanh.f32 %v2839_v29 }
 0x45c   :  { %v2102_v41 = vpop.eup %2101 }
 0x45d   :  { %v1097_v42 = vmul.f32 %v2102_v41, %v2100_v39  ;;  %v2104_v24 = vpop.eup %2103  ;;  %v1933_v41 = vld [vmem:[%s3046_s0 + $0x98] sm:$0xff] }
 0x45f   :  { %1928 = vst [vmem:[%s3050_s4 + $0x30] sm:$0xff] %v1097_v42  ;;  %v2106_v57 = vpop.eup %2105 }
 0x460   :  { %v1098_v61 = vmul.f32 %v2106_v57, %v2104_v24  ;;  %v1109_v24 = vunpack.c.l.bf16 %v1931_v52 }
 0x462   :  { %1929 = vst [vmem:[%s3050_s4 + $0x38] sm:$0xff] %v1098_v61  ;;  %v1115_v56 = vpack.c.bf16 %v1098_v61, %v1097_v42  ;;  %v1114_v61 = vunpack.c.h.bf16 %v1933_v41 }
 0x464   :  { %1181 = vmatmul.mubr.bf16.vlgmr.msra.gmra.mrb[16].mxu0 %v1115_v56  ;;  %1224 = vmatmul.mubr.bf16.vlgmr.msra.gmra.mrb[16].mxu1 %v1115_v56  ;;  %v1113_v56 = vunpack.c.l.bf16 %v1933_v41 }
 0x465   :  { %1340 = vmatpush1.bf16.msra.mxu0 %v2730_v0  ;;  %1383 = vmatpush1.bf16.msra.mxu1 %v2732_v1 }
 0x466   :  { %1341 = vmatprep.subr.bf16.mxu0 %v2736_v2  ;;  %1384 = vmatprep.subr.bf16.mxu1 %v2738_v3 }
 0x467   :  { %1371 = vmatprep.mubr.bf16.mxu0 %v2237_v60  ;;  %1414 = vmatprep.mubr.bf16.mxu1 %v2237_v60 }
 0x469   :  { %1342 = vmatpush1.bf16.msra.mxu0 %v2742_v4  ;;  %1385 = vmatpush1.bf16.msra.mxu1 %v2744_v5 }
 0x46a   :  { %1343 = vmatprep.subr.bf16.mxu0 %v2748_v6  ;;  %1386 = vmatprep.subr.bf16.mxu1 %v2750_v7 }
 0x46d   :  { %1344 = vmatpush1.bf16.msra.mxu0 %v2754_v8  ;;  %1387 = vmatpush1.bf16.msra.mxu1 %v2756_v9 }
 0x46e   :  { %1345 = vmatprep.subr.bf16.mxu0 %v2760_v10  ;;  %1388 = vmatprep.subr.bf16.mxu1 %v2762_v11 }
 0x471   :  { %1346 = vmatpush1.bf16.msra.mxu0 %v2766_v12  ;;  %1389 = vmatpush1.bf16.msra.mxu1 %v2768_v13 }
 0x472   :  { %1347 = vmatprep.subr.bf16.mxu0 %v2772_v14  ;;  %1390 = vmatprep.subr.bf16.mxu1 %v2774_v15 }
 0x475   :  { %1348 = vmatpush1.bf16.msra.mxu0 %v2776_v16  ;;  %1391 = vmatpush1.bf16.msra.mxu1 %v2780_v17 }
 0x476   :  { %1349 = vmatprep.subr.bf16.mxu0 %v2782_v18  ;;  %1392 = vmatprep.subr.bf16.mxu1 %v2784_v19 }
 0x479   :  { %1350 = vmatpush1.bf16.msra.mxu0 %v2790_v20  ;;  %1393 = vmatpush1.bf16.msra.mxu1 %v2792_v21 }
 0x47a   :  { %1351 = vmatprep.subr.bf16.mxu0 %v2794_v22  ;;  %1394 = vmatprep.subr.bf16.mxu1 %v2796_v25 }
 0x47d   :  { %1352 = vmatpush1.bf16.msra.mxu0 %v2802_v26  ;;  %1395 = vmatpush1.bf16.msra.mxu1 %v2804_v28 }
 0x47e   :  { %1353 = vmatprep.subr.bf16.mxu0 %v2806_v35  ;;  %1396 = vmatprep.subr.bf16.mxu1 %v2808_v37 }
 0x481   :  { %1354 = vmatpush1.bf16.msra.mxu0 %v2814_v38  ;;  %1397 = vmatpush1.bf16.msra.mxu1 %v2816_v36 }
 0x482   :  { %1530 = vmatprep.subr.bf16.mxu0 %v2724_v62  ;;  %1573 = vmatprep.subr.bf16.mxu1 %v2726_v63 }
 0x537   :  { %v1182_v46 = vpop.f32.mrb[16].mxu0  ;;  %v1225_v48 = vpop.f32.mrb[16].mxu1 }
 0x538   :  { %v1234_v40 = vadd.f32 %v1182_v46, %v1107_v45  ;;  %v1184_v51 = vpop.f32.mrb[17].mxu0  ;;  %v1227_v54 = vpop.f32.mrb[17].mxu1  ;;  %v1236_v43 = vadd.f32 %v1225_v48, %v1109_v24 }
 0x539   :  { %v1235_v55 = vadd.f32 %v1184_v51, %v1108_v47  ;;  %v1186_v27 = vpop.f32.mrb[18].mxu0  ;;  %v1229_v30 = vpop.f32.mrb[18].mxu1  ;;  %v1237_v57 = vadd.f32 %v1227_v54, %v1110_v58 }
 0x53a   :  { %v1934_v31 = vmul.f32 -1.442695, %v1234_v40  ;;  %v1238_v32 = vadd.f32 %v1186_v27, %v1111_v49  ;;  %v1188_v33 = vpop.f32.mrb[19].mxu0  ;;  %v1231_v23 = vpop.f32.mrb[19].mxu1  ;;  %v1240_v47 = vadd.f32 %v1229_v30, %v1113_v56 }
 0x53b   :  { %v1936_v53 = vmul.f32 -1.442695, %v1235_v55  ;;  %v1239_v59 = vadd.f32 %v1188_v33, %v1112_v50  ;;  %v1938_v44 = vmul.f32 -1.442695, %v1237_v57  ;;  %v1241_v45 = vadd.f32 %v1231_v23, %v1114_v61 }
 0x53c   :  { %2107 = vpow2.f32 %v1934_v31  ;;  %v1935_v39 = vmul.f32 -1.442695, %v1238_v32 }
 0x53d   :  { %2109 = vpow2.f32 %v1936_v53  ;;  %v1937_v42 = vmul.f32 -1.442695, %v1239_v59  ;;  %v1939_v40 = vmul.f32 -1.442695, %v1241_v45 }
 0x53e   :  { %2111 = vpow2.f32 %v1935_v39 }
 0x53f   :  { %2113 = vpow2.f32 %v1937_v42 }
 0x540   :  { %2115 = vtanh.f32 %v1236_v43 }
 0x541   :  { %2117 = vpow2.f32 %v1938_v44 }
 0x542   :  { %2119 = vtanh.f32 %v1240_v47 }
 0x546   :  { %v2108_v49 = vpop.eup %2107 }
 0x547   :  { %v2110_v46 = vpop.eup %2109  ;;  %v1248_v50 = vadd.f32 1.0, %v2108_v49 }
 0x548   :  { %v1260_v51 = vadd.f32 1.0, %v2110_v46  ;;  %v2112_v55 = vpop.eup %2111  ;;  %v1942_v46 = vld [vmem:[%s3046_s0 + $0xa0] sm:$0xff] }
 0x549   :  { %2121 = vrcp.f32 %v1248_v50  ;;  %v1249_v52 = vadd.f32 1.0, %v2112_v55  ;;  %v2114_v54 = vpop.eup %2113  ;;  %v1944_v50 = vld [vmem:[%s3046_s0 + $0xb0] sm:$0xff] }
 0x54a   :  { %2123 = vrcp.f32 %v1260_v51  ;;  %v1261_v27 = vadd.f32 1.0, %v2114_v54  ;;  %v2116_v48 = vpop.eup %2115  ;;  %v1299_v51 = vunpack.c.h.bf16 %v1942_v46  ;;  %v1302_v55 = vunpack.c.l.bf16 %v1944_v50 }
 0x54b   :  { %2125 = vpow2.f32 %v1939_v40  ;;  %v2118_v31 = vpop.eup %2117  ;;  %v1298_v40 = vunpack.c.l.bf16 %v1942_v46 }
 0x54c   :  { %2127 = vrcp.f32 %v1249_v52  ;;  %v2120_v30 = vpop.eup %2119  ;;  %v1274_v53 = vadd.f32 1.0, %v2118_v31 }
 0x54d   :  { %2129 = vrcp.f32 %v1261_v27  ;;  %v1303_v27 = vunpack.c.h.bf16 %v1944_v50 }
 0x54e   :  { %2131 = vrcp.f32 %v1274_v53 }
 0x553   :  { %v2122_v32 = vpop.eup %2121 }
 0x554   :  { %v2124_v33 = vpop.eup %2123  ;;  %v1282_v23 = vmul.f32 %v2122_v32, %v2116_v48 }
 0x555   :  { %v2126_v58 = vpop.eup %2125  ;;  %v1280_v59 = vmul.f32 %v2124_v33, %v2835_v34 }
 0x556   :  { %v2128_v39 = vpop.eup %2127  ;;  %v1275_v57 = vadd.f32 1.0, %v2126_v58 }
 0x557   :  { %v2895_v41 = vadd.f32 %v1282_v23, %v1280_v59  ;;  %v1283_v42 = vmul.f32 %v2128_v39, %v2120_v30  ;;  %v2130_v24 = vpop.eup %2129 }
 0x558   :  { %v1281_v61 = vmul.f32 %v2130_v24, %v2839_v29  ;;  %v2132_v43 = vpop.eup %2131 }
 0x559   :  { %2133 = vtanh.f32 %v2895_v41 }
 0x55a   :  { %v2899_v56 = vadd.f32 %v1283_v42, %v1281_v61  ;;  %2135 = vrcp.f32 %v1275_v57  ;;  %v1945_v61 = vld [vmem:[%s3046_s0 + $0xb8] sm:$0xff] }
 0x55c   :  { %2137 = vtanh.f32 %v2899_v56 }
 0x563   :  { %v2134_v44 = vpop.eup %2133 }
 0x564   :  { %v1288_v45 = vmul.f32 %v2134_v44, %v2132_v43  ;;  %v2136_v34 = vpop.eup %2135 }
 0x566   :  { %1940 = vst [vmem:[%s3050_s4 + $0x40] sm:$0xff] %v1288_v45  ;;  %v2138_v47 = vpop.eup %2137 }
 0x567   :  { %v1289_v49 = vmul.f32 %v2138_v47, %v2136_v34  ;;  %v1305_v34 = vunpack.c.h.bf16 %v1945_v61  ;;  %v1304_v47 = vunpack.c.l.bf16 %v1945_v61 }
 0x569   :  { %1941 = vst [vmem:[%s3050_s4 + $0x48] sm:$0xff] %v1289_v49  ;;  %v1306_v29 = vpack.c.bf16 %v1289_v49, %v1288_v45 }
 0x56b   :  { %1372 = vmatmul.mubr.bf16.vlgmr.msra.gmra.mrb[20].mxu0 %v1306_v29  ;;  %1415 = vmatmul.mubr.bf16.vlgmr.msra.gmra.mrb[20].mxu1 %v1306_v29 }
 0x56c   :  { %1531 = vmatpush1.bf16.msra.mxu0 %v2730_v0  ;;  %1574 = vmatpush1.bf16.msra.mxu1 %v2732_v1 }
 0x56d   :  { %1532 = vmatprep.subr.bf16.mxu0 %v2736_v2  ;;  %1575 = vmatprep.subr.bf16.mxu1 %v2738_v3 }
 0x56e   :  { %1562 = vmatprep.mubr.bf16.mxu0 %v2237_v60  ;;  %1605 = vmatprep.mubr.bf16.mxu1 %v2237_v60 }
 0x570   :  { %1533 = vmatpush1.bf16.msra.mxu0 %v2742_v4  ;;  %1576 = vmatpush1.bf16.msra.mxu1 %v2744_v5 }
 0x571   :  { %1534 = vmatprep.subr.bf16.mxu0 %v2748_v6  ;;  %1577 = vmatprep.subr.bf16.mxu1 %v2750_v7 }
 0x574   :  { %1535 = vmatpush1.bf16.msra.mxu0 %v2754_v8  ;;  %1578 = vmatpush1.bf16.msra.mxu1 %v2756_v9 }
 0x575   :  { %1536 = vmatprep.subr.bf16.mxu0 %v2760_v10  ;;  %1579 = vmatprep.subr.bf16.mxu1 %v2762_v11 }
 0x578   :  { %1537 = vmatpush1.bf16.msra.mxu0 %v2766_v12  ;;  %1580 = vmatpush1.bf16.msra.mxu1 %v2768_v13 }
 0x579   :  { %1538 = vmatprep.subr.bf16.mxu0 %v2772_v14  ;;  %1581 = vmatprep.subr.bf16.mxu1 %v2774_v15 }
 0x57c   :  { %1539 = vmatpush1.bf16.msra.mxu0 %v2776_v16  ;;  %1582 = vmatpush1.bf16.msra.mxu1 %v2780_v17 }
 0x57d   :  { %1540 = vmatprep.subr.bf16.mxu0 %v2782_v18  ;;  %1583 = vmatprep.subr.bf16.mxu1 %v2784_v19 }
 0x580   :  { %1541 = vmatpush1.bf16.msra.mxu0 %v2790_v20  ;;  %1584 = vmatpush1.bf16.msra.mxu1 %v2792_v21 }
 0x581   :  { %1542 = vmatprep.subr.bf16.mxu0 %v2794_v22  ;;  %1585 = vmatprep.subr.bf16.mxu1 %v2796_v25 }
 0x584   :  { %1543 = vmatpush1.bf16.msra.mxu0 %v2802_v26  ;;  %1586 = vmatpush1.bf16.msra.mxu1 %v2804_v28 }
 0x585   :  { %1544 = vmatprep.subr.bf16.mxu0 %v2806_v35  ;;  %1587 = vmatprep.subr.bf16.mxu1 %v2808_v37 }
 0x588   :  { %1545 = vmatpush1.bf16.msra.mxu0 %v2814_v38  ;;  %1588 = vmatpush1.bf16.msra.mxu1 %v2816_v36 }
 0x589   :  { %1721 = vmatprep.subr.bf16.mxu0 %v2724_v62  ;;  %1764 = vmatprep.subr.bf16.mxu1 %v2726_v63  ;;  %v1943_v62 = vld [vmem:[%s3046_s0 + $0xa8] sm:$0xff] }
 0x58a   :  { %v1301_v42 = vunpack.c.h.bf16 %v1943_v62  ;;  %v1300_v44 = vunpack.c.l.bf16 %v1943_v62 }
 0x63e   :  { %v1373_v52 = vpop.f32.mrb[20].mxu0  ;;  %v1416_v54 = vpop.f32.mrb[20].mxu1 }
 0x63f   :  { %v1425_v48 = vadd.f32 %v1373_v52, %v1298_v40  ;;  %v1375_v63 = vpop.f32.mrb[21].mxu0  ;;  %v1418_v31 = vpop.f32.mrb[21].mxu1  ;;  %v1427_v49 = vadd.f32 %v1416_v54, %v1300_v44 }
 0x640   :  { %v1426_v30 = vadd.f32 %v1375_v63, %v1299_v51  ;;  %v1377_v32 = vpop.f32.mrb[22].mxu0  ;;  %v1420_v33 = vpop.f32.mrb[22].mxu1  ;;  %v1428_v45 = vadd.f32 %v1418_v31, %v1301_v42 }
 0x641   :  { %v1946_v23 = vmul.f32 -1.442695, %v1425_v48  ;;  %v1429_v53 = vadd.f32 %v1377_v32, %v1302_v55  ;;  %v1379_v58 = vpop.f32.mrb[23].mxu0  ;;  %v1422_v59 = vpop.f32.mrb[23].mxu1  ;;  %v1431_v50 = vadd.f32 %v1420_v33, %v1304_v47 }
 0x642   :  { %v1948_v39 = vmul.f32 -1.442695, %v1426_v30  ;;  %v1430_v24 = vadd.f32 %v1379_v58, %v1303_v27  ;;  %v1950_v29 = vmul.f32 -1.442695, %v1428_v45  ;;  %v1432_v46 = vadd.f32 %v1422_v59, %v1305_v34 }
 0x643   :  { %2139 = vpow2.f32 %v1946_v23  ;;  %v1947_v57 = vmul.f32 -1.442695, %v1429_v53 }
 0x644   :  { %2141 = vpow2.f32 %v1948_v39  ;;  %v1949_v43 = vmul.f32 -1.442695, %v1430_v24  ;;  %v1951_v52 = vmul.f32 -1.442695, %v1432_v46 }
 0x645   :  { %2143 = vpow2.f32 %v1947_v57 }
 0x646   :  { %2145 = vpow2.f32 %v1949_v43 }
 0x647   :  { %2147 = vtanh.f32 %v1427_v49 }
 0x648   :  { %2149 = vpow2.f32 %v1950_v29 }
 0x649   :  { %2151 = vtanh.f32 %v1431_v50 }
 0x64d   :  { %v2140_v40 = vpop.eup %2139 }
 0x64e   :  { %v2142_v51 = vpop.eup %2141  ;;  %v1439_v55 = vadd.f32 1.0, %v2140_v40 }
 0x64f   :  { %v1451_v27 = vadd.f32 1.0, %v2142_v51  ;;  %v2144_v48 = vpop.eup %2143 }
 0x650   :  { %2153 = vrcp.f32 %v1439_v55  ;;  %v1440_v62 = vadd.f32 1.0, %v2144_v48  ;;  %v2146_v63 = vpop.eup %2145 }
 0x651   :  { %2155 = vrcp.f32 %v1451_v27  ;;  %v1452_v31 = vadd.f32 1.0, %v2146_v63  ;;  %v2148_v54 = vpop.eup %2147 }
 0x652   :  { %2157 = vpow2.f32 %v1951_v52  ;;  %v2150_v30 = vpop.eup %2149 }
 0x653   :  { %2159 = vrcp.f32 %v1440_v62  ;;  %v2152_v32 = vpop.eup %2151  ;;  %v1465_v58 = vadd.f32 1.0, %v2150_v30 }
 0x654   :  { %2161 = vrcp.f32 %v1452_v31 }
 0x655   :  { %2163 = vrcp.f32 %v1465_v58 }
 0x65a   :  { %v2154_v33 = vpop.eup %2153 }
 0x65b   :  { %v2156_v23 = vpop.eup %2155  ;;  %v1473_v53 = vmul.f32 %v2154_v33, %v2148_v54 }
 0x65c   :  { %v2158_v59 = vpop.eup %2157  ;;  %v1471_v39 = vmul.f32 %v2156_v23, %v2895_v41 }
 0x65d   :  { %v2160_v42 = vpop.eup %2159  ;;  %v1466_v43 = vadd.f32 1.0, %v2158_v59 }
 0x65e   :  { %v2955_v24 = vadd.f32 %v1473_v53, %v1471_v39  ;;  %v1474_v57 = vmul.f32 %v2160_v42, %v2152_v32  ;;  %v2162_v61 = vpop.eup %2161 }
 0x65f   :  { %v1472_v44 = vmul.f32 %v2162_v61, %v2899_v56  ;;  %v2164_v34 = vpop.eup %2163 }
 0x660   :  { %2165 = vtanh.f32 %v2955_v24 }
 0x661   :  { %v2959_v45 = vadd.f32 %v1474_v57, %v1472_v44  ;;  %2167 = vrcp.f32 %v1466_v43 }
 0x663   :  { %2169 = vtanh.f32 %v2959_v45 }
 0x66a   :  { %v2166_v47 = vpop.eup %2165 }
 0x66b   :  { %v1479_v49 = vmul.f32 %v2166_v47, %v2164_v34  ;;  %v2168_v41 = vpop.eup %2167 }
 0x66d   :  { %1952 = vst [vmem:[%s3050_s4 + $0x50] sm:$0xff] %v1479_v49  ;;  %v2170_v29 = vpop.eup %2169 }
 0x66e   :  { %v1480_v46 = vmul.f32 %v2170_v29, %v2168_v41 }
 0x670   :  { %1953 = vst [vmem:[%s3050_s4 + $0x58] sm:$0xff] %v1480_v46  ;;  %v1497_v56 = vpack.c.bf16 %v1480_v46, %v1479_v49 }
 0x672   :  { %1563 = vmatmul.mubr.bf16.vlgmr.msra.gmra.mrb[24].mxu0 %v1497_v56  ;;  %1606 = vmatmul.mubr.bf16.vlgmr.msra.gmra.mrb[24].mxu1 %v1497_v56 }
 0x673   :  { %1722 = vmatpush1.bf16.msra.mxu0 %v2730_v0  ;;  %1765 = vmatpush1.bf16.msra.mxu1 %v2732_v1  ;;  %v1956_v0 = vld [vmem:[%s3046_s0 + $0xd0] sm:$0xff] }
 0x674   :  { %1723 = vmatprep.subr.bf16.mxu0 %v2736_v2  ;;  %1766 = vmatprep.subr.bf16.mxu1 %v2738_v3  ;;  %v1493_v3 = vunpack.c.l.bf16 %v1956_v0 }
 0x675   :  { %1753 = vmatprep.mubr.bf16.mxu0 %v2237_v60  ;;  %1796 = vmatprep.mubr.bf16.mxu1 %v2237_v60  ;;  %v1954_v60 = vld [vmem:[%s3046_s0 + $0xc0] sm:$0xff] }
 0x676   :  { %v1489_v1 = vunpack.c.l.bf16 %v1954_v60  ;;  %v1490_v2 = vunpack.c.h.bf16 %v1954_v60 }
 0x677   :  { %1724 = vmatpush1.bf16.msra.mxu0 %v2742_v4  ;;  %1767 = vmatpush1.bf16.msra.mxu1 %v2744_v5 }
 0x678   :  { %1725 = vmatprep.subr.bf16.mxu0 %v2748_v6  ;;  %1768 = vmatprep.subr.bf16.mxu1 %v2750_v7  ;;  %v1494_v6 = vunpack.c.h.bf16 %v1956_v0  ;;  %v1966_v0 = vld [vmem:[%s3046_s0 + $0xe0] sm:$0xff] }
 0x67b   :  { %1726 = vmatpush1.bf16.msra.mxu0 %v2754_v8  ;;  %1769 = vmatpush1.bf16.msra.mxu1 %v2756_v9  ;;  %v1955_v8 = vld [vmem:[%s3046_s0 + $0xc8] sm:$0xff] }
 0x67c   :  { %1727 = vmatprep.subr.bf16.mxu0 %v2760_v10  ;;  %1770 = vmatprep.subr.bf16.mxu1 %v2762_v11 }
 0x67f   :  { %1728 = vmatpush1.bf16.msra.mxu0 %v2766_v12  ;;  %1771 = vmatpush1.bf16.msra.mxu1 %v2768_v13 }
 0x680   :  { %1729 = vmatprep.subr.bf16.mxu0 %v2772_v14  ;;  %1772 = vmatprep.subr.bf16.mxu1 %v2774_v15 }
 0x683   :  { %1730 = vmatpush1.bf16.msra.mxu0 %v2776_v16  ;;  %1773 = vmatpush1.bf16.msra.mxu1 %v2780_v17 }
 0x684   :  { %1731 = vmatprep.subr.bf16.mxu0 %v2782_v18  ;;  %1774 = vmatprep.subr.bf16.mxu1 %v2784_v19  ;;  %v1492_v19 = vunpack.c.h.bf16 %v1955_v8 }
 0x687   :  { %1732 = vmatpush1.bf16.msra.mxu0 %v2790_v20  ;;  %1775 = vmatpush1.bf16.msra.mxu1 %v2792_v21 }
 0x688   :  { %1733 = vmatprep.subr.bf16.mxu0 %v2794_v22  ;;  %1776 = vmatprep.subr.bf16.mxu1 %v2796_v25  ;;  %v1957_v22 = vld [vmem:[%s3046_s0 + $0xd8] sm:$0xff] }
 0x68b   :  { %1734 = vmatpush1.bf16.msra.mxu0 %v2802_v26  ;;  %1777 = vmatpush1.bf16.msra.mxu1 %v2804_v28  ;;  %v1491_v26 = vunpack.c.l.bf16 %v1955_v8 }
 0x68c   :  { %1735 = vmatprep.subr.bf16.mxu0 %v2806_v35  ;;  %1778 = vmatprep.subr.bf16.mxu1 %v2808_v37  ;;  %v1496_v35 = vunpack.c.h.bf16 %v1957_v22  ;;  %v1495_v37 = vunpack.c.l.bf16 %v1957_v22 }
 0x68f   :  { %1736 = vmatpush1.bf16.msra.mxu0 %v2814_v38  ;;  %1779 = vmatpush1.bf16.msra.mxu1 %v2816_v36 }
 0x745   :  { %v1564_v4 = vpop.f32.mrb[24].mxu0  ;;  %v1607_v5 = vpop.f32.mrb[24].mxu1 }
 0x746   :  { %v1616_v7 = vadd.f32 %v1564_v4, %v1489_v1  ;;  %v1566_v9 = vpop.f32.mrb[25].mxu0  ;;  %v1609_v10 = vpop.f32.mrb[25].mxu1  ;;  %v1618_v38 = vadd.f32 %v1607_v5, %v1491_v26  ;;  %v1968_v1 = vld [vmem:[%s3046_s0 + $0xf0] sm:$0xff] }
 0x747   :  { %v1617_v11 = vadd.f32 %v1566_v9, %v1490_v2  ;;  %v1568_v12 = vpop.f32.mrb[26].mxu0  ;;  %v1611_v13 = vpop.f32.mrb[26].mxu1  ;;  %v1619_v28 = vadd.f32 %v1609_v10, %v1492_v19  ;;  %v1680_v2 = vunpack.c.l.bf16 %v1966_v0  ;;  %v1684_v4 = vunpack.c.l.bf16 %v1968_v1  ;;  %v1967_v9 = vld [vmem:[%s3046_s0 + $0xe8] sm:$0xff] }
 0x748   :  { %v1958_v14 = vmul.f32 -1.442695, %v1616_v7  ;;  %v1620_v15 = vadd.f32 %v1568_v12, %v1493_v3  ;;  %v1570_v16 = vpop.f32.mrb[27].mxu0  ;;  %v1613_v17 = vpop.f32.mrb[27].mxu1  ;;  %v1622_v40 = vadd.f32 %v1611_v13, %v1495_v37  ;;  %v1681_v3 = vunpack.c.h.bf16 %v1966_v0 }
 0x749   :  { %v1960_v18 = vmul.f32 -1.442695, %v1617_v11  ;;  %v1621_v20 = vadd.f32 %v1570_v16, %v1494_v6  ;;  %v1962_v36 = vmul.f32 -1.442695, %v1619_v28  ;;  %v1623_v50 = vadd.f32 %v1613_v17, %v1496_v35 }
 0x74a   :  { %2171 = vpow2.f32 %v1958_v14  ;;  %v1959_v21 = vmul.f32 -1.442695, %v1620_v15  ;;  %v1685_v7 = vunpack.c.h.bf16 %v1968_v1  ;;  %v1682_v28 = vunpack.c.l.bf16 %v1967_v9 }
 0x74b   :  { %2173 = vpow2.f32 %v1960_v18  ;;  %v1961_v25 = vmul.f32 -1.442695, %v1621_v20  ;;  %v1963_v27 = vmul.f32 -1.442695, %v1623_v50  ;;  %v1683_v20 = vunpack.c.h.bf16 %v1967_v9 }
 0x74c   :  { %2175 = vpow2.f32 %v1959_v21 }
 0x74d   :  { %2177 = vpow2.f32 %v1961_v25  ;;  %v1969_v25 = vld [vmem:[%s3046_s0 + $0xf8] sm:$0xff] }
 0x74e   :  { %2179 = vtanh.f32 %v1618_v38  ;;  %v1687_v37 = vunpack.c.h.bf16 %v1969_v25  ;;  %v1686_v38 = vunpack.c.l.bf16 %v1969_v25 }
 0x74f   :  { %2181 = vpow2.f32 %v1962_v36 }
 0x750   :  { %2183 = vtanh.f32 %v1622_v40 }
 0x754   :  { %v2172_v51 = vpop.eup %2171 }
 0x755   :  { %v2174_v55 = vpop.eup %2173  ;;  %v1630_v52 = vadd.f32 1.0, %v2172_v51 }
 0x756   :  { %v1642_v48 = vadd.f32 1.0, %v2174_v55  ;;  %v2176_v62 = vpop.eup %2175 }
 0x757   :  { %2185 = vrcp.f32 %v1630_v52  ;;  %v1631_v63 = vadd.f32 1.0, %v2176_v62  ;;  %v2178_v31 = vpop.eup %2177 }
 0x758   :  { %2187 = vrcp.f32 %v1642_v48  ;;  %v1643_v54 = vadd.f32 1.0, %v2178_v31  ;;  %v2180_v30 = vpop.eup %2179 }
 0x759   :  { %2189 = vpow2.f32 %v1963_v27  ;;  %v2182_v32 = vpop.eup %2181 }
 0x75a   :  { %2191 = vrcp.f32 %v1631_v63  ;;  %v2184_v33 = vpop.eup %2183  ;;  %v1656_v59 = vadd.f32 1.0, %v2182_v32 }
 0x75b   :  { %2193 = vrcp.f32 %v1643_v54 }
 0x75c   :  { %2195 = vrcp.f32 %v1656_v59 }
 0x761   :  { %v2186_v23 = vpop.eup %2185 }
 0x762   :  { %v2188_v53 = vpop.eup %2187  ;;  %v1664_v58 = vmul.f32 %v2186_v23, %v2180_v30 }
 0x763   :  { %v2190_v39 = vpop.eup %2189  ;;  %v1662_v42 = vmul.f32 %v2188_v53, %v2955_v24 }
 0x764   :  { %v2192_v57 = vpop.eup %2191  ;;  %v1657_v34 = vadd.f32 1.0, %v2190_v39 }
 0x765   :  { %v3013_v61 = vadd.f32 %v1664_v58, %v1662_v42  ;;  %v1665_v43 = vmul.f32 %v2192_v57, %v2184_v33  ;;  %v2194_v44 = vpop.eup %2193 }
 0x766   :  { %v1663_v47 = vmul.f32 %v2194_v44, %v2959_v45  ;;  %v2196_v41 = vpop.eup %2195 }
 0x767   :  { %2197 = vtanh.f32 %v3013_v61 }
 0x768   :  { %v3017_v49 = vadd.f32 %v1665_v43, %v1663_v47  ;;  %2199 = vrcp.f32 %v1657_v34 }
 0x76a   :  { %2201 = vtanh.f32 %v3017_v49 }
 0x771   :  { %v2198_v29 = vpop.eup %2197 }
 0x772   :  { %v1670_v46 = vmul.f32 %v2198_v29, %v2196_v41  ;;  %v2200_v24 = vpop.eup %2199 }
 0x774   :  { %1964 = vst [vmem:[%s3050_s4 + $0x60] sm:$0xff] %v1670_v46  ;;  %v2202_v56 = vpop.eup %2201 }
 0x775   :  { %v1671_v60 = vmul.f32 %v2202_v56, %v2200_v24 }
 0x777   :  { %1965 = vst [vmem:[%s3050_s4 + $0x68] sm:$0xff] %v1671_v60  ;;  %v1688_v45 = vpack.c.bf16 %v1671_v60, %v1670_v46 }
 0x779   :  { %1754 = vmatmul.mubr.bf16.vlgmr.msra.gmra.mrb[28].mxu0 %v1688_v45  ;;  %1797 = vmatmul.mubr.bf16.vlgmr.msra.gmra.mrb[28].mxu1 %v1688_v45 }
 0x84c   :  { %v1755_v5 = vpop.f32.mrb[28].mxu0  ;;  %v1798_v6 = vpop.f32.mrb[28].mxu1 }
 0x84d   :  { %v1807_v8 = vadd.f32 %v1755_v5, %v1680_v2  ;;  %v1757_v10 = vpop.f32.mrb[29].mxu0  ;;  %v1800_v11 = vpop.f32.mrb[29].mxu1  ;;  %v1809_v36 = vadd.f32 %v1798_v6, %v1682_v28 }
 0x84e   :  { %v1808_v12 = vadd.f32 %v1757_v10, %v1681_v3  ;;  %v1759_v13 = vpop.f32.mrb[30].mxu0  ;;  %v1802_v14 = vpop.f32.mrb[30].mxu1  ;;  %v1810_v35 = vadd.f32 %v1800_v11, %v1683_v20 }
 0x84f   :  { %v1970_v15 = vmul.f32 -1.442695, %v1807_v8  ;;  %v1811_v16 = vadd.f32 %v1759_v13, %v1684_v4  ;;  %v1761_v17 = vpop.f32.mrb[31].mxu0  ;;  %v1804_v18 = vpop.f32.mrb[31].mxu1  ;;  %v1813_v51 = vadd.f32 %v1802_v14, %v1686_v38 }
 0x850   :  { %v1972_v19 = vmul.f32 -1.442695, %v1808_v12  ;;  %v1812_v21 = vadd.f32 %v1761_v17, %v1685_v7  ;;  %v1974_v50 = vmul.f32 -1.442695, %v1810_v35  ;;  %v1814_v40 = vadd.f32 %v1804_v18, %v1687_v37 }
 0x851   :  { %2203 = vpow2.f32 %v1970_v15  ;;  %v1971_v22 = vmul.f32 -1.442695, %v1811_v16 }
 0x852   :  { %2205 = vpow2.f32 %v1972_v19  ;;  %v1973_v26 = vmul.f32 -1.442695, %v1812_v21  ;;  %v1975_v48 = vmul.f32 -1.442695, %v1814_v40 }
 0x853   :  { %2207 = vpow2.f32 %v1971_v22 }
 0x854   :  { %2209 = vpow2.f32 %v1973_v26 }
 0x855   :  { %2211 = vtanh.f32 %v1809_v36 }
 0x856   :  { %2213 = vpow2.f32 %v1974_v50 }
 0x857   :  { %2215 = vtanh.f32 %v1813_v51 }
 0x85b   :  { %v2204_v55 = vpop.eup %2203 }
 0x85c   :  { %v2206_v52 = vpop.eup %2205  ;;  %v1821_v27 = vadd.f32 1.0, %v2204_v55 }
 0x85d   :  { %v1833_v62 = vadd.f32 1.0, %v2206_v52  ;;  %v2208_v63 = vpop.eup %2207 }
 0x85e   :  { %2217 = vrcp.f32 %v1821_v27  ;;  %v1822_v31 = vadd.f32 1.0, %v2208_v63  ;;  %v2210_v54 = vpop.eup %2209 }
 0x85f   :  { %2219 = vrcp.f32 %v1833_v62  ;;  %v1834_v30 = vadd.f32 1.0, %v2210_v54  ;;  %v2212_v32 = vpop.eup %2211 }
 0x860   :  { %2221 = vpow2.f32 %v1975_v48  ;;  %v2214_v33 = vpop.eup %2213 }
 0x861   :  { %2223 = vrcp.f32 %v1822_v31  ;;  %v2216_v23 = vpop.eup %2215  ;;  %v1847_v39 = vadd.f32 1.0, %v2214_v33 }
 0x862   :  { %2225 = vrcp.f32 %v1834_v30 }
 0x863   :  { %2227 = vrcp.f32 %v1847_v39 }
 0x868   :  { %v2218_v53 = vpop.eup %2217 }
 0x869   :  { %v2220_v58 = vpop.eup %2219  ;;  %v1855_v59 = vmul.f32 %v2218_v53, %v2212_v32 }
 0x86a   :  { %v2222_v42 = vpop.eup %2221  ;;  %v1853_v57 = vmul.f32 %v2220_v58, %v3013_v61 }
 0x86b   :  { %v2224_v43 = vpop.eup %2223  ;;  %v1848_v41 = vadd.f32 1.0, %v2222_v42 }
 0x86c   :  { %v1857_v44 = vadd.f32 %v1855_v59, %v1853_v57  ;;  %v1856_v34 = vmul.f32 %v2224_v43, %v2216_v23  ;;  %v2226_v47 = vpop.eup %2225 }
 0x86d   :  { %v1854_v29 = vmul.f32 %v2226_v47, %v3017_v49  ;;  %v2228_v24 = vpop.eup %2227 }
 0x86e   :  { %2229 = vtanh.f32 %v1857_v44 }
 0x86f   :  { %v1858_v46 = vadd.f32 %v1856_v34, %v1854_v29  ;;  %2231 = vrcp.f32 %v1848_v41 }
 0x871   :  { %2233 = vtanh.f32 %v1858_v46 }
 0x878   :  { %v2230_v56 = vpop.eup %2229 }
 0x879   :  { %v1861_v60 = vmul.f32 %v2230_v56, %v2228_v24  ;;  %v2232_v45 = vpop.eup %2231 }
 0x87b   :  { %1976 = vst [vmem:[%s3050_s4 + $0x70] sm:$0xff] %v1861_v60  ;;  %v2234_v61 = vpop.eup %2233 }
 0x87c   :  { %v1862_v0 = vmul.f32 %v2234_v61, %v2232_v45 }
 0x87e   :  { %1977 = vst [vmem:[%s3050_s4 + $0x78] sm:$0xff] %v1862_v0 }

</bundles_post_ra>
